<compile_context>
chip_gen: v7x
topology: tpu7x:2x2x1
jax: 0.10.0
libtpu: 0.0.40
codegen_flags: <defaults>
</compile_context>

<pallas_src>
import functools
import math

import jax
import jax.numpy as jnp
from jax.experimental import pallas as pl
from jax.experimental.pallas import tpu as pltpu

# ----- mini config (bert-base scaled down) -----------------------------------
B, S = 2, 8            # batch, sequence length
H, NH = 32, 2          # true hidden size, attention heads
DH = H // NH           # true per-head dim
I = 64                 # true FFN intermediate size
L = 2                  # transformer layers
VOCAB = 100
EPS = 1e-12            # BERT LayerNorm eps

# lane-padded sizes (multiples of 128; pad entries are exact zeros)
HP = 128               # padded hidden
DP = 128               # padded per-head slab
IP = 128               # padded FFN intermediate
LANE = 128             # padded logits width
QW = NH * DP           # width of one q/k/v slab group (= 256)


# ----- BlockSpec helpers -------------------------------------------------------
def _const_spec(shape):
    """Full-block input, same block every grid step."""
    n = len(shape)
    return pl.BlockSpec(shape, lambda l, _n=n: (0,) * _n)


def _layer_spec(shape):
    """Stacked-by-layer input [L, *shape]; grid step l selects layer l's block."""
    n = len(shape)
    return pl.BlockSpec((1,) + shape, lambda l, _n=n: (l,) + (0,) * _n)


# ----- in-kernel math ----------------------------------------------------------
def _gelu(x):
    # TODO(synk): BERT uses exact erf-GELU; tanh approximation used here.
    return 0.5 * x * (1.0 + jnp.tanh(0.7978845608028654 * (x + 0.044715 * x * x * x)))


def _ln_pad(x, g, beta, inv_h, eps):
    """LayerNorm over lane-padded rows.

    Pad lanes of x are exactly zero, so sum(x)/H_true and sum(x^2)/H_true give the
    true statistics; g/beta are zero in pad lanes, so pad lanes stay zero in the
    output (keeps the zero-pad invariant across layers).
    """
    mu = jnp.sum(x, axis=-1, keepdims=True) * inv_h
    var = jnp.maximum(jnp.sum(x * x, axis=-1, keepdims=True) * inv_h - mu * mu, 0.0)
    return (x - mu) * jax.lax.rsqrt(var + eps) * g + beta


def _fused_forward_kernel(x_emb_ref, mask_ref, eg_ref, ebt_ref,
                          qkv_w_ref, qkv_b_ref, ow_ref, ob_ref,
                          ln1g_ref, ln1b_ref,
                          iw_ref, ib_ref, dw_ref, db_ref,
                          ln2g_ref, ln2b_ref,
                          pw_ref, pb_ref, fw_ref, fb_ref,
                          out_ref, x_sc,
                          *, b, s, nh, dp, inv_h, scale, eps):
    l = pl.program_id(0)
    rows = b * s
    qw = nh * dp

    # ---- prologue (layer 0): embedding LayerNorm into the resident activation ----
    @pl.when(l == 0)
    def _():
        x_sc[...] = _ln_pad(x_emb_ref[...], eg_ref[...], ebt_ref[...], inv_h, eps)

    x = x_sc[...]                                   # [rows, HP] f32, pad lanes zero
    x_bf = x.astype(jnp.bfloat16)                   # cast once for the MXU

    # ---- fused QKV projection: one bf16 MXU pass, f32 accumulation ----
    qkv = jnp.dot(x_bf, qkv_w_ref[0], preferred_element_type=jnp.float32) + qkv_b_ref[0]

    # ---- attention: batch handled by einsum; each head is a 128-lane slab ----
    bias = mask_ref[...].reshape(b, 1, s)           # additive 0 / -1e9, hoisted broadcast
    ctx_heads = []
    for hh in range(nh):                            # tiny static loop (NH=2), 128-aligned slices
        q_h = qkv[:, 0 * qw + hh * dp:0 * qw + (hh + 1) * dp].reshape(b, s, dp).astype(jnp.bfloat16)
        k_h = qkv[:, 1 * qw + hh * dp:1 * qw + (hh + 1) * dp].reshape(b, s, dp).astype(jnp.bfloat16)
        v_h = qkv[:, 2 * qw + hh * dp:2 * qw + (hh + 1) * dp].reshape(b, s, dp).astype(jnp.bfloat16)
        sc = jnp.einsum('bqd,bkd->bqk', q_h, k_h,
                        preferred_element_type=jnp.float32) * scale + bias
        sc = sc - jnp.max(sc, axis=-1, keepdims=True)
        p = jnp.exp(sc)
        p = p * pl.reciprocal(jnp.sum(p, axis=-1, keepdims=True), approx=True)
        ctx_h = jnp.einsum('bqk,bkd->bqd', p.astype(jnp.bfloat16), v_h,
                           preferred_element_type=jnp.float32)       # [b, s, dp]
        ctx_heads.append(ctx_h.reshape(rows, dp))
    ctx = jnp.concatenate(ctx_heads, axis=-1).astype(jnp.bfloat16)    # [rows, qw], 128-aligned

    # ---- attention output projection + add & LayerNorm 1 ----
    attn = jnp.dot(ctx, ow_ref[0], preferred_element_type=jnp.float32) + ob_ref[0]
    y = _ln_pad(attn + x, ln1g_ref[0], ln1b_ref[0], inv_h, eps)

    # ---- FFN (gelu) + add & LayerNorm 2 ----
    ff = jnp.dot(y.astype(jnp.bfloat16), iw_ref[0],
                 preferred_element_type=jnp.float32) + ib_ref[0]
    ff = _gelu(ff)
    ffo = jnp.dot(ff.astype(jnp.bfloat16), dw_ref[0],
                  preferred_element_type=jnp.float32) + db_ref[0]
    z = _ln_pad(ffo + y, ln2g_ref[0], ln2b_ref[0], inv_h, eps)

    x_sc[...] = z                                   # VMEM-resident carry to next layer

    # ---- epilogue (last layer): pooler tanh + dropout(identity) + fc ----
    @pl.when(l == pl.num_programs(0) - 1)
    def _():
        # CLS rows are rows {0, S, 2S, ...} of the resident activation (sublane-aligned slices).
        cls = jnp.concatenate([z[bb * s:bb * s + 1, :] for bb in range(b)], axis=0)   # [B, HP]
        pooled = jnp.tanh(jnp.dot(cls.astype(jnp.bfloat16), pw_ref[...],
                                  preferred_element_type=jnp.float32) + pb_ref[...])
        # nn.Dropout(0.3): identity at inference (no RNG applied)
        out_ref[...] = jnp.dot(pooled.astype(jnp.bfloat16), fw_ref[...],
                               preferred_element_type=jnp.float32) + fb_ref[...]


# ----- single fused pallas_call ------------------------------------------------
def fused_forward(x_emb_pad, mask_bias, p):
    in_specs = [
        _const_spec((B * S, HP)),            # x_emb (pre-LN embeddings)
        _const_spec((B, S)),                 # additive attention bias
        _const_spec((1, HP)),                # emb LN gamma
        _const_spec((1, HP)),                # emb LN beta
        _layer_spec((HP, 3 * QW)),           # qkv_w   [L, HP, 3*QW]
        _layer_spec((1, 3 * QW)),            # qkv_b
        _layer_spec((QW, HP)),               # o_w
        _layer_spec((1, HP)),                # o_b
        _layer_spec((1, HP)),                # ln1_g
        _layer_spec((1, HP)),                # ln1_b
        _layer_spec((HP, IP)),               # i_w
        _layer_spec((1, IP)),                # i_b
        _layer_spec((IP, HP)),               # d_w
        _layer_spec((1, HP)),                # d_b
        _layer_spec((1, HP)),                # ln2_g
        _layer_spec((1, HP)),                # ln2_b
        _const_spec((HP, HP)),               # pooler W
        _const_spec((1, HP)),                # pooler b
        _const_spec((HP, LANE)),             # fc W (lane-padded)
        _const_spec((1, LANE)),              # fc b (lane-padded)
    ]
    args = (x_emb_pad, mask_bias, p["emb_ln_g"], p["emb_ln_b"],
            p["qkv_w"], p["qkv_b"], p["o_w"], p["o_b"], p["ln1_g"], p["ln1_b"],
            p["i_w"], p["i_b"], p["d_w"], p["d_b"], p["ln2_g"], p["ln2_b"],
            p["pool_w"], p["pool_b"], p["fc_w_pad"], p["fc_b_pad"])

    # advisory cost estimate so XLA schedules the embedding gather around the long call
    bytes_accessed = sum(int(a.size) * a.dtype.itemsize for a in args) + B * LANE * 4
    flops_layer = (2 * B * S * HP * 3 * QW
                   + 2 * B * NH * S * S * DP * 2
                   + 2 * B * S * QW * HP
                   + 2 * B * S * HP * IP
                   + 2 * B * S * IP * HP)
    flops = L * flops_layer + 2 * B * HP * HP + 2 * B * HP * LANE
    transc = L * (B * NH * S * S + B * S * IP) + B * HP

    return pl.pallas_call(
        functools.partial(_fused_forward_kernel, b=B, s=S, nh=NH, dp=DP,
                          inv_h=1.0 / H, scale=1.0 / math.sqrt(DH), eps=EPS),
        out_shape=jax.ShapeDtypeStruct((B, LANE), jnp.float32),
        grid_spec=pltpu.PrefetchScalarGridSpec(
            num_scalar_prefetch=0,
            grid=(L,),                                  # one grid step per encoder layer
            in_specs=in_specs,
            out_specs=_const_spec((B, LANE)),
            scratch_shapes=[pltpu.VMEM((B * S, HP), jnp.float32)]),   # activation carry
        compiler_params=pltpu.CompilerParams(
            dimension_semantics=("arbitrary",),         # layers are sequentially dependent
            vmem_limit_bytes=32 * 1024 * 1024),
        cost_estimate=pl.CostEstimate(flops=flops, transcendentals=transc,
                                      bytes_accessed=bytes_accessed),
    )(*args)


# ----- deterministic parameter init (lane-padded, layer-stacked) -----------------
def init_params(key):
    keys = jax.random.split(key, 4 + L)
    p = {
        "word_emb": 0.02 * jax.random.normal(keys[0], (VOCAB, H), jnp.float32),
        "pos_emb":  0.02 * jax.random.normal(keys[1], (S, H), jnp.float32),
        "type_emb": 0.02 * jax.random.normal(keys[2], (2, H), jnp.float32),
        "emb_ln_g": jnp.zeros((1, HP), jnp.float32).at[:, :H].set(1.0),
        "emb_ln_b": jnp.zeros((1, HP), jnp.float32),
    }
    ln_g_pad = jnp.zeros((1, HP), jnp.float32).at[:, :H].set(1.0)
    ln_b_pad = jnp.zeros((1, HP), jnp.float32)

    qkv_w_l, o_w_l, i_w_l, d_w_l = [], [], [], []
    for l in range(L):
        lk = jax.random.split(keys[3 + l], 6)
        q_w = 0.02 * jax.random.normal(lk[0], (H, H), jnp.float32)
        k_w = 0.02 * jax.random.normal(lk[1], (H, H), jnp.float32)
        v_w = 0.02 * jax.random.normal(lk[2], (H, H), jnp.float32)
        o_w = 0.02 * jax.random.normal(lk[3], (H, H), jnp.float32)
        i_w = 0.02 * jax.random.normal(lk[4], (H, I), jnp.float32)
        d_w = 0.02 * jax.random.normal(lk[5], (I, H), jnp.float32)

        # QKV -> [HP, 3*QW]: per (type, head) 128-lane slab, real data in the first DH lanes.
        qkv_pad = jnp.zeros((HP, 3 * QW), jnp.float32)
        for t, w_t in enumerate((q_w, k_w, v_w)):
            for hh in range(NH):
                c0 = t * QW + hh * DP
                qkv_pad = qkv_pad.at[:H, c0:c0 + DH].set(w_t[:, hh * DH:(hh + 1) * DH])
        qkv_w_l.append(qkv_pad)

        # attention output projection: rows follow the per-head slab layout of ctx.
        o_pad = jnp.zeros((QW, HP), jnp.float32)
        for hh in range(NH):
            o_pad = o_pad.at[hh * DP:hh * DP + DH, :H].set(o_w[hh * DH:(hh + 1) * DH, :])
        o_w_l.append(o_pad)

        i_w_l.append(jnp.zeros((HP, IP), jnp.float32).at[:H, :I].set(i_w))
        d_w_l.append(jnp.zeros((IP, HP), jnp.float32).at[:I, :H].set(d_w))

    # stacked per-layer weights (MXU weights stored bf16; biases / LN params f32)
    p["qkv_w"] = jnp.stack(qkv_w_l).astype(jnp.bfloat16)       # [L, HP, 3*QW]
    p["qkv_b"] = jnp.zeros((L, 1, 3 * QW), jnp.float32)
    p["o_w"]   = jnp.stack(o_w_l).astype(jnp.bfloat16)         # [L, QW, HP]
    p["o_b"]   = jnp.zeros((L, 1, HP), jnp.float32)
    p["i_w"]   = jnp.stack(i_w_l).astype(jnp.bfloat16)         # [L, HP, IP]
    p["i_b"]   = jnp.zeros((L, 1, IP), jnp.float32)
    p["d_w"]   = jnp.stack(d_w_l).astype(jnp.bfloat16)         # [L, IP, HP]
    p["d_b"]   = jnp.zeros((L, 1, HP), jnp.float32)
    p["ln1_g"] = jnp.tile(ln_g_pad[None], (L, 1, 1))
    p["ln1_b"] = jnp.tile(ln_b_pad[None], (L, 1, 1))
    p["ln2_g"] = jnp.tile(ln_g_pad[None], (L, 1, 1))
    p["ln2_b"] = jnp.tile(ln_b_pad[None], (L, 1, 1))

    pk = jax.random.split(keys[3 + L], 2)
    pool_w = 0.02 * jax.random.normal(pk[0], (H, H), jnp.float32)
    fc_w   = 0.02 * jax.random.normal(pk[1], (H, 1), jnp.float32)
    p["pool_w"]   = jnp.zeros((HP, HP), jnp.float32).at[:H, :H].set(pool_w).astype(jnp.bfloat16)
    p["pool_b"]   = jnp.zeros((1, HP), jnp.float32)
    p["fc_w_pad"] = jnp.zeros((HP, LANE), jnp.float32).at[:H, :1].set(fc_w).astype(jnp.bfloat16)
    # TODO(synk): when loading a real checkpoint, write the fc bias into fc_b_pad[:, 0].
    p["fc_b_pad"] = jnp.zeros((1, LANE), jnp.float32)
    return p


# ----- forward pass (matches SentimentModel.forward) ----------------------------
def sentiment_forward(params, input_ids, attention_mask):
    # BERT embeddings (gather is glue in plain JAX), then zero-pad hidden 32 -> 128.
    x = (jnp.take(params["word_emb"], input_ids, axis=0)          # [B, S, H]
         + params["pos_emb"][None, :, :]
         + params["type_emb"][0][None, None, :])
    x = x.reshape(B * S, H).astype(jnp.float32)
    x_pad = jnp.zeros((B * S, HP), jnp.float32).at[:, :H].set(x)

    mask_bias = (1.0 - attention_mask.astype(jnp.float32)) * -1e9  # [B, S] additive bias

    logits_pad = fused_forward(x_pad, mask_bias, params)           # [B, 128] lane-dense store
    return logits_pad[:, :1]                                       # [B, 1]


if __name__ == "__main__":
    key = jax.random.PRNGKey(0)
    pkey, ikey = jax.random.split(key)
    params = init_params(pkey)

    input_ids = jax.random.randint(ikey, (B, S), 0, VOCAB, dtype=jnp.int32)
    attention_mask = jnp.ones((B, S), jnp.int32).at[1, 6:].set(0)   # pad tail of batch 1

    fwd = jax.jit(sentiment_forward)
    out = fwd(params, input_ids, attention_mask)
    jax.block_until_ready(out)
    assert out.shape == (B, 1) and out.dtype == jnp.float32
    assert bool(jnp.all(jnp.isfinite(out)))
    print("KERNEL_OK")
</pallas_src>

<mosaic_0001>
module attributes {stable_mosaic.version = 11 : i64} {
  func.func @_fused_forward_kernel(%arg0: i32, %arg1: memref<16x128xf32, #tpu.memory_space<vmem>>, %arg2: memref<2x8xf32, #tpu.memory_space<vmem>>, %arg3: memref<1x128xf32, #tpu.memory_space<vmem>>, %arg4: memref<1x128xf32, #tpu.memory_space<vmem>>, %arg5: memref<1x128x768xbf16, #tpu.memory_space<vmem>>, %arg6: memref<1x1x768xf32, #tpu.memory_space<vmem>>, %arg7: memref<1x256x128xbf16, #tpu.memory_space<vmem>>, %arg8: memref<1x1x128xf32, #tpu.memory_space<vmem>>, %arg9: memref<1x1x128xf32, #tpu.memory_space<vmem>>, %arg10: memref<1x1x128xf32, #tpu.memory_space<vmem>>, %arg11: memref<1x128x128xbf16, #tpu.memory_space<vmem>>, %arg12: memref<1x1x128xf32, #tpu.memory_space<vmem>>, %arg13: memref<1x128x128xbf16, #tpu.memory_space<vmem>>, %arg14: memref<1x1x128xf32, #tpu.memory_space<vmem>>, %arg15: memref<1x1x128xf32, #tpu.memory_space<vmem>>, %arg16: memref<1x1x128xf32, #tpu.memory_space<vmem>>, %arg17: memref<128x128xbf16, #tpu.memory_space<vmem>>, %arg18: memref<1x128xf32, #tpu.memory_space<vmem>>, %arg19: memref<128x128xbf16, #tpu.memory_space<vmem>>, %arg20: memref<1x128xf32, #tpu.memory_space<vmem>>, %arg21: memref<2x128xf32, #tpu.memory_space<vmem>>, %arg22: memref<16x128xf32, #tpu.memory_space<vmem>>) attributes {dimension_semantics = [#tpu.dimension_semantics<arbitrary>], iteration_bounds = array<i64: 2>, scalar_prefetch = 0 : i64, scratch_operands = 1 : i64, tpu.core_type = #tpu.core_type<tc>, window_params = [{pipeline_mode = #tpu.pipeline_mode<synchronous>, transform_indices = @transform_0, window_bounds = array<i64: 16, 128>}, {pipeline_mode = #tpu.pipeline_mode<synchronous>, transform_indices = @transform_1, window_bounds = array<i64: 2, 8>}, {pipeline_mode = #tpu.pipeline_mode<synchronous>, transform_indices = @transform_2, window_bounds = array<i64: 1, 128>}, {pipeline_mode = #tpu.pipeline_mode<synchronous>, transform_indices = @transform_3, window_bounds = array<i64: 1, 128>}, {transform_indices = @transform_4, window_bounds = array<i64: 1, 128, 768>}, {transform_indices = @transform_5, window_bounds = array<i64: 1, 1, 768>}, {transform_indices = @transform_6, window_bounds = array<i64: 1, 256, 128>}, {transform_indices = @transform_7, window_bounds = array<i64: 1, 1, 128>}, {transform_indices = @transform_8, window_bounds = array<i64: 1, 1, 128>}, {transform_indices = @transform_9, window_bounds = array<i64: 1, 1, 128>}, {transform_indices = @transform_10, window_bounds = array<i64: 1, 128, 128>}, {transform_indices = @transform_11, window_bounds = array<i64: 1, 1, 128>}, {transform_indices = @transform_12, window_bounds = array<i64: 1, 128, 128>}, {transform_indices = @transform_13, window_bounds = array<i64: 1, 1, 128>}, {transform_indices = @transform_14, window_bounds = array<i64: 1, 1, 128>}, {transform_indices = @transform_15, window_bounds = array<i64: 1, 1, 128>}, {pipeline_mode = #tpu.pipeline_mode<synchronous>, transform_indices = @transform_16, window_bounds = array<i64: 128, 128>}, {pipeline_mode = #tpu.pipeline_mode<synchronous>, transform_indices = @transform_17, window_bounds = array<i64: 1, 128>}, {pipeline_mode = #tpu.pipeline_mode<synchronous>, transform_indices = @transform_18, window_bounds = array<i64: 128, 128>}, {pipeline_mode = #tpu.pipeline_mode<synchronous>, transform_indices = @transform_19, window_bounds = array<i64: 1, 128>}, {pipeline_mode = #tpu.pipeline_mode<synchronous>, transform_indices = @transform_20, window_bounds = array<i64: 2, 128>}]} {
    %c0_i32 = arith.constant 0 : i32
    %0 = arith.cmpi eq, %arg0, %c0_i32 : i32
    %1 = arith.extui %0 : i1 to i32
    %c0_i32_0 = arith.constant 0 : i32
    %2 = arith.cmpi ne, %1, %c0_i32_0 : i32
    scf.if %2 {
      %c0_72 = arith.constant 0 : index
      %c0_73 = arith.constant 0 : index
      %168 = vector.load %arg1[%c0_72, %c0_73] : memref<16x128xf32, #tpu.memory_space<vmem>>, vector<16x128xf32>
      %c0_74 = arith.constant 0 : index
      %c0_75 = arith.constant 0 : index
      %169 = vector.load %arg3[%c0_74, %c0_75] : memref<1x128xf32, #tpu.memory_space<vmem>>, vector<1x128xf32>
      %c0_76 = arith.constant 0 : index
      %c0_77 = arith.constant 0 : index
      %170 = vector.load %arg4[%c0_76, %c0_77] : memref<1x128xf32, #tpu.memory_space<vmem>>, vector<1x128xf32>
      %cst_78 = arith.constant dense<0.000000e+00> : vector<16xf32>
      %171 = vector.multi_reduction <add>, %168, %cst_78 [1] : vector<16x128xf32> to vector<16xf32>
      %172 = vector.shape_cast %171 : vector<16xf32> to vector<16x1xf32>
      %cst_79 = arith.constant 3.125000e-02 : f32
      %173 = vector.broadcast %cst_79 : f32 to vector<16x1xf32>
      %174 = arith.mulf %172, %173 : vector<16x1xf32>
      %175 = arith.mulf %168, %168 : vector<16x128xf32>
      %cst_80 = arith.constant dense<0.000000e+00> : vector<16xf32>
      %176 = vector.multi_reduction <add>, %175, %cst_80 [1] : vector<16x128xf32> to vector<16xf32>
      %177 = vector.shape_cast %176 : vector<16xf32> to vector<16x1xf32>
      %cst_81 = arith.constant 3.125000e-02 : f32
      %178 = vector.broadcast %cst_81 : f32 to vector<16x1xf32>
      %179 = arith.mulf %177, %178 : vector<16x1xf32>
      %180 = arith.mulf %174, %174 : vector<16x1xf32>
      %181 = arith.subf %179, %180 : vector<16x1xf32>
      %cst_82 = arith.constant 0.000000e+00 : f32
      %182 = vector.broadcast %cst_82 : f32 to vector<16x1xf32>
      %183 = arith.maximumf %181, %182 : vector<16x1xf32>
      %184 = vector.broadcast %174 : vector<16x1xf32> to vector<16x128xf32>
      %185 = arith.subf %168, %184 : vector<16x128xf32>
      %cst_83 = arith.constant 9.99999996E-13 : f32
      %186 = vector.broadcast %cst_83 : f32 to vector<16x1xf32>
      %187 = arith.addf %183, %186 : vector<16x1xf32>
      %188 = math.rsqrt %187 : vector<16x1xf32>
      %189 = vector.broadcast %188 : vector<16x1xf32> to vector<16x128xf32>
      %190 = arith.mulf %185, %189 : vector<16x128xf32>
      %191 = vector.broadcast %169 : vector<1x128xf32> to vector<16x128xf32>
      %192 = arith.mulf %190, %191 : vector<16x128xf32>
      %193 = vector.broadcast %170 : vector<1x128xf32> to vector<16x128xf32>
      %194 = arith.addf %192, %193 : vector<16x128xf32>
      %c0_84 = arith.constant 0 : index
      %c0_85 = arith.constant 0 : index
      %195 = vector.load %arg22[%c0_84, %c0_85] : memref<16x128xf32, #tpu.memory_space<vmem>>, vector<16x128xf32>
      tpu.vector_store %arg22[%c0_84, %c0_85], %194 {strides = array<i32>} : memref<16x128xf32, #tpu.memory_space<vmem>>, vector<16x128xf32>,
    } else {
    }
    %c0 = arith.constant 0 : index
    %c0_1 = arith.constant 0 : index
    %3 = vector.load %arg22[%c0, %c0_1] : memref<16x128xf32, #tpu.memory_space<vmem>>, vector<16x128xf32>
    %4 = arith.truncf %3 : vector<16x128xf32> to vector<16x128xbf16>
    %c0_2 = arith.constant 0 : index
    %c0_3 = arith.constant 0 : index
    %c0_4 = arith.constant 0 : index
    %5 = vector.load %arg5[%c0_2, %c0_3, %c0_4] : memref<1x128x768xbf16, #tpu.memory_space<vmem>>, vector<1x128x768xbf16>
    %6 = vector.shape_cast %5 : vector<1x128x768xbf16> to vector<128x768xbf16>
    %cst = arith.constant dense<0.000000e+00> : vector<16x768xf32>
    %7 = tpu.matmul %4, %6, %cst {dimension_numbers = #tpu.dot_dimension_numbers<[1], [0], [0], [1], [0, 0, 1, 1], [], []>} : vector<16x128xbf16>, vector<128x768xbf16>, vector<16x768xf32> -> vector<16x768xf32>
    %c0_5 = arith.constant 0 : index
    %c0_6 = arith.constant 0 : index
    %c0_7 = arith.constant 0 : index
    %8 = vector.load %arg6[%c0_5, %c0_6, %c0_7] : memref<1x1x768xf32, #tpu.memory_space<vmem>>, vector<1x1x768xf32>
    %9 = vector.shape_cast %8 : vector<1x1x768xf32> to vector<1x768xf32>
    %10 = vector.broadcast %9 : vector<1x768xf32> to vector<16x768xf32>
    %11 = arith.addf %7, %10 : vector<16x768xf32>
    %c0_8 = arith.constant 0 : index
    %c0_9 = arith.constant 0 : index
    %12 = vector.load %arg2[%c0_8, %c0_9] : memref<2x8xf32, #tpu.memory_space<vmem>>, vector<2x8xf32>
    %13 = vector.shape_cast %12 : vector<2x8xf32> to vector<2x1x8xf32>
    %14 = vector.extract_strided_slice %11 {offsets = [0, 0], sizes = [16, 128], strides = [1, 1]} : vector<16x768xf32> to vector<16x128xf32>
    %15 = vector.shape_cast %14 : vector<16x128xf32> to vector<2x8x128xf32>
    %16 = arith.truncf %15 : vector<2x8x128xf32> to vector<2x8x128xbf16>
    %17 = vector.extract_strided_slice %11 {offsets = [0, 256], sizes = [16, 128], strides = [1, 1]} : vector<16x768xf32> to vector<16x128xf32>
    %18 = vector.shape_cast %17 : vector<16x128xf32> to vector<2x8x128xf32>
    %19 = arith.truncf %18 : vector<2x8x128xf32> to vector<2x8x128xbf16>
    %20 = vector.extract_strided_slice %11 {offsets = [0, 512], sizes = [16, 128], strides = [1, 1]} : vector<16x768xf32> to vector<16x128xf32>
    %21 = vector.shape_cast %20 : vector<16x128xf32> to vector<2x8x128xf32>
    %22 = arith.truncf %21 : vector<2x8x128xf32> to vector<2x8x128xbf16>
    "tpu.trace_start"() <{level = 10 : i32, message = "bqd,bkd->bqk"}> : () -> ()
    %cst_10 = arith.constant dense<0.000000e+00> : vector<2x8x8xf32>
    %23 = tpu.matmul %16, %19, %cst_10 {dimension_numbers = #tpu.dot_dimension_numbers<[2], [2], [1], [1], [0, 0, 0, 1, 1, 1], [0], [0]>} : vector<2x8x128xbf16>, vector<2x8x128xbf16>, vector<2x8x8xf32> -> vector<2x8x8xf32>
    "tpu.trace_stop"() : () -> ()
    %cst_11 = arith.constant 2.500000e-01 : f32
    %24 = vector.broadcast %cst_11 : f32 to vector<2x8x8xf32>
    %25 = arith.mulf %23, %24 : vector<2x8x8xf32>
    %26 = vector.broadcast %13 : vector<2x1x8xf32> to vector<2x8x8xf32>
    %27 = arith.addf %25, %26 : vector<2x8x8xf32>
    %cst_12 = arith.constant dense<0xFF800000> : vector<2x8xf32>
    %28 = vector.multi_reduction <maximumf>, %27, %cst_12 [2] : vector<2x8x8xf32> to vector<2x8xf32>
    %29 = vector.shape_cast %28 : vector<2x8xf32> to vector<2x8x1xf32>
    %30 = vector.broadcast %29 : vector<2x8x1xf32> to vector<2x8x8xf32>
    %31 = arith.subf %27, %30 : vector<2x8x8xf32>
    %32 = math.exp %31 : vector<2x8x8xf32>
    %cst_13 = arith.constant dense<0.000000e+00> : vector<2x8xf32>
    %33 = vector.multi_reduction <add>, %32, %cst_13 [2] : vector<2x8x8xf32> to vector<2x8xf32>
    %34 = vector.shape_cast %33 : vector<2x8xf32> to vector<2x8x1xf32>
    %35 = tpu.reciprocal %34 {approx = true} : vector<2x8x1xf32> -> vector<2x8x1xf32>
    %36 = vector.broadcast %35 : vector<2x8x1xf32> to vector<2x8x8xf32>
    %37 = arith.mulf %32, %36 : vector<2x8x8xf32>
    %38 = arith.truncf %37 : vector<2x8x8xf32> to vector<2x8x8xbf16>
    "tpu.trace_start"() <{level = 10 : i32, message = "bqk,bkd->bqd"}> : () -> ()
    %cst_14 = arith.constant dense<0.000000e+00> : vector<2x8x128xf32>
    %39 = tpu.matmul %38, %22, %cst_14 {dimension_numbers = #tpu.dot_dimension_numbers<[2], [1], [1], [2], [0, 0, 0, 1, 1, 2], [0], [0]>} : vector<2x8x8xbf16>, vector<2x8x128xbf16>, vector<2x8x128xf32> -> vector<2x8x128xf32>
    "tpu.trace_stop"() : () -> ()
    %40 = vector.shape_cast %39 : vector<2x8x128xf32> to vector<16x128xf32>
    %41 = vector.extract_strided_slice %11 {offsets = [0, 128], sizes = [16, 128], strides = [1, 1]} : vector<16x768xf32> to vector<16x128xf32>
    %42 = vector.shape_cast %41 : vector<16x128xf32> to vector<2x8x128xf32>
    %43 = arith.truncf %42 : vector<2x8x128xf32> to vector<2x8x128xbf16>
    %44 = vector.extract_strided_slice %11 {offsets = [0, 384], sizes = [16, 128], strides = [1, 1]} : vector<16x768xf32> to vector<16x128xf32>
    %45 = vector.shape_cast %44 : vector<16x128xf32> to vector<2x8x128xf32>
    %46 = arith.truncf %45 : vector<2x8x128xf32> to vector<2x8x128xbf16>
    %47 = vector.extract_strided_slice %11 {offsets = [0, 640], sizes = [16, 128], strides = [1, 1]} : vector<16x768xf32> to vector<16x128xf32>
    %48 = vector.shape_cast %47 : vector<16x128xf32> to vector<2x8x128xf32>
    %49 = arith.truncf %48 : vector<2x8x128xf32> to vector<2x8x128xbf16>
    "tpu.trace_start"() <{level = 10 : i32, message = "bqd,bkd->bqk"}> : () -> ()
    %cst_15 = arith.constant dense<0.000000e+00> : vector<2x8x8xf32>
    %50 = tpu.matmul %43, %46, %cst_15 {dimension_numbers = #tpu.dot_dimension_numbers<[2], [2], [1], [1], [0, 0, 0, 1, 1, 1], [0], [0]>} : vector<2x8x128xbf16>, vector<2x8x128xbf16>, vector<2x8x8xf32> -> vector<2x8x8xf32>
    "tpu.trace_stop"() : () -> ()
    %cst_16 = arith.constant 2.500000e-01 : f32
    %51 = vector.broadcast %cst_16 : f32 to vector<2x8x8xf32>
    %52 = arith.mulf %50, %51 : vector<2x8x8xf32>
    %53 = vector.broadcast %13 : vector<2x1x8xf32> to vector<2x8x8xf32>
    %54 = arith.addf %52, %53 : vector<2x8x8xf32>
    %cst_17 = arith.constant dense<0xFF800000> : vector<2x8xf32>
    %55 = vector.multi_reduction <maximumf>, %54, %cst_17 [2] : vector<2x8x8xf32> to vector<2x8xf32>
    %56 = vector.shape_cast %55 : vector<2x8xf32> to vector<2x8x1xf32>
    %57 = vector.broadcast %56 : vector<2x8x1xf32> to vector<2x8x8xf32>
    %58 = arith.subf %54, %57 : vector<2x8x8xf32>
    %59 = math.exp %58 : vector<2x8x8xf32>
    %cst_18 = arith.constant dense<0.000000e+00> : vector<2x8xf32>
    %60 = vector.multi_reduction <add>, %59, %cst_18 [2] : vector<2x8x8xf32> to vector<2x8xf32>
    %61 = vector.shape_cast %60 : vector<2x8xf32> to vector<2x8x1xf32>
    %62 = tpu.reciprocal %61 {approx = true} : vector<2x8x1xf32> -> vector<2x8x1xf32>
    %63 = vector.broadcast %62 : vector<2x8x1xf32> to vector<2x8x8xf32>
    %64 = arith.mulf %59, %63 : vector<2x8x8xf32>
    %65 = arith.truncf %64 : vector<2x8x8xf32> to vector<2x8x8xbf16>
    "tpu.trace_start"() <{level = 10 : i32, message = "bqk,bkd->bqd"}> : () -> ()
    %cst_19 = arith.constant dense<0.000000e+00> : vector<2x8x128xf32>
    %66 = tpu.matmul %65, %49, %cst_19 {dimension_numbers = #tpu.dot_dimension_numbers<[2], [1], [1], [2], [0, 0, 0, 1, 1, 2], [0], [0]>} : vector<2x8x8xbf16>, vector<2x8x128xbf16>, vector<2x8x128xf32> -> vector<2x8x128xf32>
    "tpu.trace_stop"() : () -> ()
    %67 = vector.shape_cast %66 : vector<2x8x128xf32> to vector<16x128xf32>
    %68 = tpu.concatenate %40, %67 in 1 : vector<16x128xf32>, vector<16x128xf32> -> vector<16x256xf32>
    %69 = arith.truncf %68 : vector<16x256xf32> to vector<16x256xbf16>
    %c0_20 = arith.constant 0 : index
    %c0_21 = arith.constant 0 : index
    %c0_22 = arith.constant 0 : index
    %70 = vector.load %arg7[%c0_20, %c0_21, %c0_22] : memref<1x256x128xbf16, #tpu.memory_space<vmem>>, vector<1x256x128xbf16>
    %71 = vector.shape_cast %70 : vector<1x256x128xbf16> to vector<256x128xbf16>
    %cst_23 = arith.constant dense<0.000000e+00> : vector<16x128xf32>
    %72 = tpu.matmul %69, %71, %cst_23 {dimension_numbers = #tpu.dot_dimension_numbers<[1], [0], [0], [1], [0, 0, 1, 1], [], []>} : vector<16x256xbf16>, vector<256x128xbf16>, vector<16x128xf32> -> vector<16x128xf32>
    %c0_24 = arith.constant 0 : index
    %c0_25 = arith.constant 0 : index
    %c0_26 = arith.constant 0 : index
    %73 = vector.load %arg8[%c0_24, %c0_25, %c0_26] : memref<1x1x128xf32, #tpu.memory_space<vmem>>, vector<1x1x128xf32>
    %74 = vector.shape_cast %73 : vector<1x1x128xf32> to vector<1x128xf32>
    %75 = vector.broadcast %74 : vector<1x128xf32> to vector<16x128xf32>
    %76 = arith.addf %72, %75 : vector<16x128xf32>
    %77 = arith.addf %76, %3 : vector<16x128xf32>
    %c0_27 = arith.constant 0 : index
    %c0_28 = arith.constant 0 : index
    %c0_29 = arith.constant 0 : index
    %78 = vector.load %arg9[%c0_27, %c0_28, %c0_29] : memref<1x1x128xf32, #tpu.memory_space<vmem>>, vector<1x1x128xf32>
    %79 = vector.shape_cast %78 : vector<1x1x128xf32> to vector<1x128xf32>
    %c0_30 = arith.constant 0 : index
    %c0_31 = arith.constant 0 : index
    %c0_32 = arith.constant 0 : index
    %80 = vector.load %arg10[%c0_30, %c0_31, %c0_32] : memref<1x1x128xf32, #tpu.memory_space<vmem>>, vector<1x1x128xf32>
    %81 = vector.shape_cast %80 : vector<1x1x128xf32> to vector<1x128xf32>
    %cst_33 = arith.constant dense<0.000000e+00> : vector<16xf32>
    %82 = vector.multi_reduction <add>, %77, %cst_33 [1] : vector<16x128xf32> to vector<16xf32>
    %83 = vector.shape_cast %82 : vector<16xf32> to vector<16x1xf32>
    %cst_34 = arith.constant 3.125000e-02 : f32
    %84 = vector.broadcast %cst_34 : f32 to vector<16x1xf32>
    %85 = arith.mulf %83, %84 : vector<16x1xf32>
    %86 = arith.mulf %77, %77 : vector<16x128xf32>
    %cst_35 = arith.constant dense<0.000000e+00> : vector<16xf32>
    %87 = vector.multi_reduction <add>, %86, %cst_35 [1] : vector<16x128xf32> to vector<16xf32>
    %88 = vector.shape_cast %87 : vector<16xf32> to vector<16x1xf32>
    %cst_36 = arith.constant 3.125000e-02 : f32
    %89 = vector.broadcast %cst_36 : f32 to vector<16x1xf32>
    %90 = arith.mulf %88, %89 : vector<16x1xf32>
    %91 = arith.mulf %85, %85 : vector<16x1xf32>
    %92 = arith.subf %90, %91 : vector<16x1xf32>
    %cst_37 = arith.constant 0.000000e+00 : f32
    %93 = vector.broadcast %cst_37 : f32 to vector<16x1xf32>
    %94 = arith.maximumf %92, %93 : vector<16x1xf32>
    %95 = vector.broadcast %85 : vector<16x1xf32> to vector<16x128xf32>
    %96 = arith.subf %77, %95 : vector<16x128xf32>
    %cst_38 = arith.constant 9.99999996E-13 : f32
    %97 = vector.broadcast %cst_38 : f32 to vector<16x1xf32>
    %98 = arith.addf %94, %97 : vector<16x1xf32>
    %99 = math.rsqrt %98 : vector<16x1xf32>
    %100 = vector.broadcast %99 : vector<16x1xf32> to vector<16x128xf32>
    %101 = arith.mulf %96, %100 : vector<16x128xf32>
    %102 = vector.broadcast %79 : vector<1x128xf32> to vector<16x128xf32>
    %103 = arith.mulf %101, %102 : vector<16x128xf32>
    %104 = vector.broadcast %81 : vector<1x128xf32> to vector<16x128xf32>
    %105 = arith.addf %103, %104 : vector<16x128xf32>
    %106 = arith.truncf %105 : vector<16x128xf32> to vector<16x128xbf16>
    %c0_39 = arith.constant 0 : index
    %c0_40 = arith.constant 0 : index
    %c0_41 = arith.constant 0 : index
    %107 = vector.load %arg11[%c0_39, %c0_40, %c0_41] : memref<1x128x128xbf16, #tpu.memory_space<vmem>>, vector<1x128x128xbf16>
    %108 = vector.shape_cast %107 : vector<1x128x128xbf16> to vector<128x128xbf16>
    %cst_42 = arith.constant dense<0.000000e+00> : vector<16x128xf32>
    %109 = tpu.matmul %106, %108, %cst_42 {dimension_numbers = #tpu.dot_dimension_numbers<[1], [0], [0], [1], [0, 0, 1, 1], [], []>} : vector<16x128xbf16>, vector<128x128xbf16>, vector<16x128xf32> -> vector<16x128xf32>
    %c0_43 = arith.constant 0 : index
    %c0_44 = arith.constant 0 : index
    %c0_45 = arith.constant 0 : index
    %110 = vector.load %arg12[%c0_43, %c0_44, %c0_45] : memref<1x1x128xf32, #tpu.memory_space<vmem>>, vector<1x1x128xf32>
    %111 = vector.shape_cast %110 : vector<1x1x128xf32> to vector<1x128xf32>
    %112 = vector.broadcast %111 : vector<1x128xf32> to vector<16x128xf32>
    %113 = arith.addf %109, %112 : vector<16x128xf32>
    %cst_46 = arith.constant 5.000000e-01 : f32
    %114 = vector.broadcast %cst_46 : f32 to vector<16x128xf32>
    %115 = arith.mulf %114, %113 : vector<16x128xf32>
    %cst_47 = arith.constant 4.471500e-02 : f32
    %116 = vector.broadcast %cst_47 : f32 to vector<16x128xf32>
    %117 = arith.mulf %116, %113 : vector<16x128xf32>
    %118 = arith.mulf %117, %113 : vector<16x128xf32>
    %119 = arith.mulf %118, %113 : vector<16x128xf32>
    %120 = arith.addf %113, %119 : vector<16x128xf32>
    %cst_48 = arith.constant 0.797884583 : f32
    %121 = vector.broadcast %cst_48 : f32 to vector<16x128xf32>
    %122 = arith.mulf %121, %120 : vector<16x128xf32>
    %123 = math.tanh %122 : vector<16x128xf32>
    %cst_49 = arith.constant 1.000000e+00 : f32
    %124 = vector.broadcast %cst_49 : f32 to vector<16x128xf32>
    %125 = arith.addf %124, %123 : vector<16x128xf32>
    %126 = arith.mulf %115, %125 : vector<16x128xf32>
    %127 = arith.truncf %126 : vector<16x128xf32> to vector<16x128xbf16>
    %c0_50 = arith.constant 0 : index
    %c0_51 = arith.constant 0 : index
    %c0_52 = arith.constant 0 : index
    %128 = vector.load %arg13[%c0_50, %c0_51, %c0_52] : memref<1x128x128xbf16, #tpu.memory_space<vmem>>, vector<1x128x128xbf16>
    %129 = vector.shape_cast %128 : vector<1x128x128xbf16> to vector<128x128xbf16>
    %cst_53 = arith.constant dense<0.000000e+00> : vector<16x128xf32>
    %130 = tpu.matmul %127, %129, %cst_53 {dimension_numbers = #tpu.dot_dimension_numbers<[1], [0], [0], [1], [0, 0, 1, 1], [], []>} : vector<16x128xbf16>, vector<128x128xbf16>, vector<16x128xf32> -> vector<16x128xf32>
    %c0_54 = arith.constant 0 : index
    %c0_55 = arith.constant 0 : index
    %c0_56 = arith.constant 0 : index
    %131 = vector.load %arg14[%c0_54, %c0_55, %c0_56] : memref<1x1x128xf32, #tpu.memory_space<vmem>>, vector<1x1x128xf32>
    %132 = vector.shape_cast %131 : vector<1x1x128xf32> to vector<1x128xf32>
    %133 = vector.broadcast %132 : vector<1x128xf32> to vector<16x128xf32>
    %134 = arith.addf %130, %133 : vector<16x128xf32>
    %135 = arith.addf %134, %105 : vector<16x128xf32>
    %c0_57 = arith.constant 0 : index
    %c0_58 = arith.constant 0 : index
    %c0_59 = arith.constant 0 : index
    %136 = vector.load %arg15[%c0_57, %c0_58, %c0_59] : memref<1x1x128xf32, #tpu.memory_space<vmem>>, vector<1x1x128xf32>
    %137 = vector.shape_cast %136 : vector<1x1x128xf32> to vector<1x128xf32>
    %c0_60 = arith.constant 0 : index
    %c0_61 = arith.constant 0 : index
    %c0_62 = arith.constant 0 : index
    %138 = vector.load %arg16[%c0_60, %c0_61, %c0_62] : memref<1x1x128xf32, #tpu.memory_space<vmem>>, vector<1x1x128xf32>
    %139 = vector.shape_cast %138 : vector<1x1x128xf32> to vector<1x128xf32>
    %cst_63 = arith.constant dense<0.000000e+00> : vector<16xf32>
    %140 = vector.multi_reduction <add>, %135, %cst_63 [1] : vector<16x128xf32> to vector<16xf32>
    %141 = vector.shape_cast %140 : vector<16xf32> to vector<16x1xf32>
    %cst_64 = arith.constant 3.125000e-02 : f32
    %142 = vector.broadcast %cst_64 : f32 to vector<16x1xf32>
    %143 = arith.mulf %141, %142 : vector<16x1xf32>
    %144 = arith.mulf %135, %135 : vector<16x128xf32>
    %cst_65 = arith.constant dense<0.000000e+00> : vector<16xf32>
    %145 = vector.multi_reduction <add>, %144, %cst_65 [1] : vector<16x128xf32> to vector<16xf32>
    %146 = vector.shape_cast %145 : vector<16xf32> to vector<16x1xf32>
    %cst_66 = arith.constant 3.125000e-02 : f32
    %147 = vector.broadcast %cst_66 : f32 to vector<16x1xf32>
    %148 = arith.mulf %146, %147 : vector<16x1xf32>
    %149 = arith.mulf %143, %143 : vector<16x1xf32>
    %150 = arith.subf %148, %149 : vector<16x1xf32>
    %cst_67 = arith.constant 0.000000e+00 : f32
    %151 = vector.broadcast %cst_67 : f32 to vector<16x1xf32>
    %152 = arith.maximumf %150, %151 : vector<16x1xf32>
    %153 = vector.broadcast %143 : vector<16x1xf32> to vector<16x128xf32>
    %154 = arith.subf %135, %153 : vector<16x128xf32>
    %cst_68 = arith.constant 9.99999996E-13 : f32
    %155 = vector.broadcast %cst_68 : f32 to vector<16x1xf32>
    %156 = arith.addf %152, %155 : vector<16x1xf32>
    %157 = math.rsqrt %156 : vector<16x1xf32>
    %158 = vector.broadcast %157 : vector<16x1xf32> to vector<16x128xf32>
    %159 = arith.mulf %154, %158 : vector<16x128xf32>
    %160 = vector.broadcast %137 : vector<1x128xf32> to vector<16x128xf32>
    %161 = arith.mulf %159, %160 : vector<16x128xf32>
    %162 = vector.broadcast %139 : vector<1x128xf32> to vector<16x128xf32>
    %163 = arith.addf %161, %162 : vector<16x128xf32>
    %c0_69 = arith.constant 0 : index
    %c0_70 = arith.constant 0 : index
    %164 = vector.load %arg22[%c0_69, %c0_70] : memref<16x128xf32, #tpu.memory_space<vmem>>, vector<16x128xf32>
    tpu.vector_store %arg22[%c0_69, %c0_70], %163 {strides = array<i32>} : memref<16x128xf32, #tpu.memory_space<vmem>>, vector<16x128xf32>,
    %c1_i32 = arith.constant 1 : i32
    %165 = arith.cmpi eq, %arg0, %c1_i32 : i32
    %166 = arith.extui %165 : i1 to i32
    %c0_i32_71 = arith.constant 0 : i32
    %167 = arith.cmpi ne, %166, %c0_i32_71 : i32
    scf.if %167 {
      %168 = vector.extract_strided_slice %163 {offsets = [0, 0], sizes = [1, 128], strides = [1, 1]} : vector<16x128xf32> to vector<1x128xf32>
      %169 = vector.extract_strided_slice %163 {offsets = [8, 0], sizes = [1, 128], strides = [1, 1]} : vector<16x128xf32> to vector<1x128xf32>
      %170 = tpu.concatenate %168, %169 in 0 : vector<1x128xf32>, vector<1x128xf32> -> vector<2x128xf32>
      %171 = arith.truncf %170 : vector<2x128xf32> to vector<2x128xbf16>
      %c0_72 = arith.constant 0 : index
      %c0_73 = arith.constant 0 : index
      %172 = vector.load %arg17[%c0_72, %c0_73] : memref<128x128xbf16, #tpu.memory_space<vmem>>, vector<128x128xbf16>
      %cst_74 = arith.constant dense<0.000000e+00> : vector<2x128xf32>
      %173 = tpu.matmul %171, %172, %cst_74 {dimension_numbers = #tpu.dot_dimension_numbers<[1], [0], [0], [1], [0, 0, 1, 1], [], []>} : vector<2x128xbf16>, vector<128x128xbf16>, vector<2x128xf32> -> vector<2x128xf32>
      %c0_75 = arith.constant 0 : index
      %c0_76 = arith.constant 0 : index
      %174 = vector.load %arg18[%c0_75, %c0_76] : memref<1x128xf32, #tpu.memory_space<vmem>>, vector<1x128xf32>
      %175 = vector.broadcast %174 : vector<1x128xf32> to vector<2x128xf32>
      %176 = arith.addf %173, %175 : vector<2x128xf32>
      %177 = math.tanh %176 : vector<2x128xf32>
      %178 = arith.truncf %177 : vector<2x128xf32> to vector<2x128xbf16>
      %c0_77 = arith.constant 0 : index
      %c0_78 = arith.constant 0 : index
      %179 = vector.load %arg19[%c0_77, %c0_78] : memref<128x128xbf16, #tpu.memory_space<vmem>>, vector<128x128xbf16>
      %cst_79 = arith.constant dense<0.000000e+00> : vector<2x128xf32>
      %180 = tpu.matmul %178, %179, %cst_79 {dimension_numbers = #tpu.dot_dimension_numbers<[1], [0], [0], [1], [0, 0, 1, 1], [], []>} : vector<2x128xbf16>, vector<128x128xbf16>, vector<2x128xf32> -> vector<2x128xf32>
      %c0_80 = arith.constant 0 : index
      %c0_81 = arith.constant 0 : index
      %181 = vector.load %arg20[%c0_80, %c0_81] : memref<1x128xf32, #tpu.memory_space<vmem>>, vector<1x128xf32>
      %182 = vector.broadcast %181 : vector<1x128xf32> to vector<2x128xf32>
      %183 = arith.addf %180, %182 : vector<2x128xf32>
      %c0_82 = arith.constant 0 : index
      %c0_83 = arith.constant 0 : index
      %184 = vector.load %arg21[%c0_82, %c0_83] : memref<2x128xf32, #tpu.memory_space<vmem>>, vector<2x128xf32>
      tpu.vector_store %arg21[%c0_82, %c0_83], %183 {strides = array<i32>} : memref<2x128xf32, #tpu.memory_space<vmem>>, vector<2x128xf32>,
    } else {
    }
    return
  }
  func.func @transform_0(%arg0: i32) -> (i32, i32) {
    %c0_i32 = arith.constant 0 : i32
    %c0_i32_0 = arith.constant 0 : i32
    %c0_i32_1 = arith.constant 0 : i32
    return %c0_i32, %c0_i32_0 : i32, i32
  }
  func.func @transform_1(%arg0: i32) -> (i32, i32) {
    %c0_i32 = arith.constant 0 : i32
    %c0_i32_0 = arith.constant 0 : i32
    %c0_i32_1 = arith.constant 0 : i32
    return %c0_i32, %c0_i32_0 : i32, i32
  }
  func.func @transform_2(%arg0: i32) -> (i32, i32) {
    %c0_i32 = arith.constant 0 : i32
    %c0_i32_0 = arith.constant 0 : i32
    %c0_i32_1 = arith.constant 0 : i32
    return %c0_i32, %c0_i32_0 : i32, i32
  }
  func.func @transform_3(%arg0: i32) -> (i32, i32) {
    %c0_i32 = arith.constant 0 : i32
    %c0_i32_0 = arith.constant 0 : i32
    %c0_i32_1 = arith.constant 0 : i32
    return %c0_i32, %c0_i32_0 : i32, i32
  }
  func.func @transform_4(%arg0: i32) -> (i32, i32, i32) {
    %c0_i32 = arith.constant 0 : i32
    %c0_i32_0 = arith.constant 0 : i32
    %c0_i32_1 = arith.constant 0 : i32
    return %arg0, %c0_i32, %c0_i32_0 : i32, i32, i32
  }
  func.func @transform_5(%arg0: i32) -> (i32, i32, i32) {
    %c0_i32 = arith.constant 0 : i32
    %c0_i32_0 = arith.constant 0 : i32
    %c0_i32_1 = arith.constant 0 : i32
    return %arg0, %c0_i32, %c0_i32_0 : i32, i32, i32
  }
  func.func @transform_6(%arg0: i32) -> (i32, i32, i32) {
    %c0_i32 = arith.constant 0 : i32
    %c0_i32_0 = arith.constant 0 : i32
    %c0_i32_1 = arith.constant 0 : i32
    return %arg0, %c0_i32, %c0_i32_0 : i32, i32, i32
  }
  func.func @transform_7(%arg0: i32) -> (i32, i32, i32) {
    %c0_i32 = arith.constant 0 : i32
    %c0_i32_0 = arith.constant 0 : i32
    %c0_i32_1 = arith.constant 0 : i32
    return %arg0, %c0_i32, %c0_i32_0 : i32, i32, i32
  }
  func.func @transform_8(%arg0: i32) -> (i32, i32, i32) {
    %c0_i32 = arith.constant 0 : i32
    %c0_i32_0 = arith.constant 0 : i32
    %c0_i32_1 = arith.constant 0 : i32
    return %arg0, %c0_i32, %c0_i32_0 : i32, i32, i32
  }
  func.func @transform_9(%arg0: i32) -> (i32, i32, i32) {
    %c0_i32 = arith.constant 0 : i32
    %c0_i32_0 = arith.constant 0 : i32
    %c0_i32_1 = arith.constant 0 : i32
    return %arg0, %c0_i32, %c0_i32_0 : i32, i32, i32
  }
  func.func @transform_10(%arg0: i32) -> (i32, i32, i32) {
    %c0_i32 = arith.constant 0 : i32
    %c0_i32_0 = arith.constant 0 : i32
    %c0_i32_1 = arith.constant 0 : i32
    return %arg0, %c0_i32, %c0_i32_0 : i32, i32, i32
  }
  func.func @transform_11(%arg0: i32) -> (i32, i32, i32) {
    %c0_i32 = arith.constant 0 : i32
    %c0_i32_0 = arith.constant 0 : i32
    %c0_i32_1 = arith.constant 0 : i32
    return %arg0, %c0_i32, %c0_i32_0 : i32, i32, i32
  }
  func.func @transform_12(%arg0: i32) -> (i32, i32, i32) {
    %c0_i32 = arith.constant 0 : i32
    %c0_i32_0 = arith.constant 0 : i32
    %c0_i32_1 = arith.constant 0 : i32
    return %arg0, %c0_i32, %c0_i32_0 : i32, i32, i32
  }
  func.func @transform_13(%arg0: i32) -> (i32, i32, i32) {
    %c0_i32 = arith.constant 0 : i32
    %c0_i32_0 = arith.constant 0 : i32
    %c0_i32_1 = arith.constant 0 : i32
    return %arg0, %c0_i32, %c0_i32_0 : i32, i32, i32
  }
  func.func @transform_14(%arg0: i32) -> (i32, i32, i32) {
    %c0_i32 = arith.constant 0 : i32
    %c0_i32_0 = arith.constant 0 : i32
    %c0_i32_1 = arith.constant 0 : i32
    return %arg0, %c0_i32, %c0_i32_0 : i32, i32, i32
  }
  func.func @transform_15(%arg0: i32) -> (i32, i32, i32) {
    %c0_i32 = arith.constant 0 : i32
    %c0_i32_0 = arith.constant 0 : i32
    %c0_i32_1 = arith.constant 0 : i32
    return %arg0, %c0_i32, %c0_i32_0 : i32, i32, i32
  }
  func.func @transform_16(%arg0: i32) -> (i32, i32) {
    %c0_i32 = arith.constant 0 : i32
    %c0_i32_0 = arith.constant 0 : i32
    %c0_i32_1 = arith.constant 0 : i32
    return %c0_i32, %c0_i32_0 : i32, i32
  }
  func.func @transform_17(%arg0: i32) -> (i32, i32) {
    %c0_i32 = arith.constant 0 : i32
    %c0_i32_0 = arith.constant 0 : i32
    %c0_i32_1 = arith.constant 0 : i32
    return %c0_i32, %c0_i32_0 : i32, i32
  }
  func.func @transform_18(%arg0: i32) -> (i32, i32) {
    %c0_i32 = arith.constant 0 : i32
    %c0_i32_0 = arith.constant 0 : i32
    %c0_i32_1 = arith.constant 0 : i32
    return %c0_i32, %c0_i32_0 : i32, i32
  }
  func.func @transform_19(%arg0: i32) -> (i32, i32) {
    %c0_i32 = arith.constant 0 : i32
    %c0_i32_0 = arith.constant 0 : i32
    %c0_i32_1 = arith.constant 0 : i32
    return %c0_i32, %c0_i32_0 : i32, i32
  }
  func.func @transform_20(%arg0: i32) -> (i32, i32) {
    %c0_i32 = arith.constant 0 : i32
    %c0_i32_0 = arith.constant 0 : i32
    %c0_i32_1 = arith.constant 0 : i32
    return %c0_i32, %c0_i32_0 : i32, i32
  }
}

</mosaic_0001>

<bundles_post_ra>
// kernel: sentiment_forward.1
= control target key start
LH: loop header
LB: loop body
LE: loop exit
PB: predicated region body
PF: predicated region fallthrough
CT: control target
= control target key end

     0   :  { %s4324_s0 = inlined_call_operand.vmem [shape: f32[16,128], index: 0, kind: input, shape index: {}]   ;;  %s4325_s1 = inlined_call_operand.vmem [shape: f32[2,8], index: 1, kind: input, shape index: {}]   ;;  %s4326_s2 = inlined_call_operand.vmem [shape: f32[1,128], index: 2, kind: input, shape index: {}]   ;;  %s4327_s3 = inlined_call_operand.vmem [shape: f32[1,128], index: 3, kind: input, shape index: {}]   ;;  %s4328_s4 = inlined_call_operand.hbm [shape: bf16[2,128,768], index: 4, kind: input, shape index: {}]   ;;  %s4329_s5 = inlined_call_operand.vmem [shape: f32[2,1,768], index: 5, kind: input, shape index: {}]   ;;  %s4330_s6 = inlined_call_operand.vmem [shape: bf16[2,256,128], index: 6, kind: input, shape index: {}]   ;;  %s4331_s7 = inlined_call_operand.vmem [shape: f32[2,1,128], index: 7, kind: input, shape index: {}]   ;;  %s4332_s8 = inlined_call_operand.vmem [shape: f32[2,1,128], index: 8, kind: input, shape index: {}]   ;;  %s4333_s9 = inlined_call_operand.vmem [shape: f32[2,1,128], index: 9, kind: input, shape index: {}]   ;;  %s4334_s10 = inlined_call_operand.vmem [shape: bf16[2,128,128], index: 10, kind: input, shape index: {}]   ;;  %s4335_s11 = inlined_call_operand.vmem [shape: f32[2,1,128], index: 11, kind: input, shape index: {}]   ;;  %s4336_s12 = inlined_call_operand.hbm [shape: bf16[2,128,128], index: 12, kind: input, shape index: {}]   ;;  %s4337_s13 = inlined_call_operand.vmem [shape: f32[2,1,128], index: 13, kind: input, shape index: {}]   ;;  %s4338_s14 = inlined_call_operand.vmem [shape: f32[2,1,128], index: 14, kind: input, shape index: {}]   ;;  %s4339_s15 = inlined_call_operand.hbm [shape: f32[2,1,128], index: 15, kind: input, shape index: {}]   ;;  %s4340_s16 = inlined_call_operand.hbm [shape: bf16[128,128], index: 16, kind: input, shape index: {}]   ;;  %s4341_s17 = inlined_call_operand.hbm [shape: f32[1,128], index: 17, kind: input, shape index: {}]   ;;  %s4342_s18 = inlined_call_operand.hbm [shape: bf16[128,128], index: 18, kind: input, shape index: {}]   ;;  %s4343_s19 = inlined_call_operand.vmem [shape: f32[1,128], index: 19, kind: input, shape index: {}]   ;;  %s4344_s20 = inlined_call_operand.vmem [shape: f32[2,128], index: 20, kind: output, shape index: {}]  }
   0x1   :  { %4363 = sst [smem:[#allocation20_spill]] %s4324_s0 }
   0x2   :  { %4364 = sst [smem:[#allocation21_spill]] %s4325_s1 }
   0x3   :  { %4365 = sst [smem:[#allocation22_spill]] %s4326_s2 }
   0x4   :  { %4366 = sst [smem:[#allocation23_spill]] %s4327_s3 }
   0x5   :  { %4367 = sst [smem:[#allocation24_spill]] %s4328_s4 }
   0x6   :  { %4368 = sst [smem:[#allocation25_spill]] %s4329_s5 }
   0x7   :  { %4369 = sst [smem:[#allocation26_spill]] %s4330_s6 }
   0x8   :  { %4370 = sst [smem:[#allocation27_spill]] %s4332_s8 }
   0x9   :  { %4371 = sst [smem:[#allocation28_spill]] %s4333_s9 }
   0xa   :  { %4372 = sst [smem:[#allocation29_spill]] %s4334_s10 }
   0xb   :  { %4373 = sst [smem:[#allocation30_spill]] %s4335_s11 }
   0xc   :  { %4374 = sst [smem:[#allocation31_spill]] %s4336_s12 }
   0xd   :  { %4375 = sst [smem:[#allocation32_spill]] %s4337_s13 }
   0xe   :  { %4376 = sst [smem:[#allocation33_spill]] %s4338_s14 }
   0xf   :  { %4377 = sst [smem:[#allocation34_spill]] %s4339_s15 }
  0x10   :  { %4378 = sst [smem:[#allocation35_spill]] %s4340_s16 }
  0x11   :  { %4379 = sst [smem:[#allocation36_spill]] %s4341_s17 }
  0x12   :  { %4380 = sst [smem:[#allocation37_spill]] %s4343_s19 }
  0x13   :  { %4381 = sst [smem:[#allocation38_spill]] %s4344_s20 }
  0x14   :  { %25 = vsyncpa [#allocation4], 0 }
  0x15   :  { %27 = vsyncpa [#allocation4 + $0x1], 0 }
  0x16   :  { %28 = vsyncpa [#allocation6], 0 }
  0x17   :  { %30 = vsyncpa [#allocation6 + $0x1], 0 }
  0x18   :  { %31 = vsyncpa [#allocation9], 0 }
  0x19   :  { %32 = vsyncpa [#allocation12], 0  ;;  %s3729_s1 = smov 0   ;;  %s3731_s22 = smov 0  }
  0x1a   :  { %s3733_s23 = smov 0   ;;  %s3735_s24 = smov 0  }
  0x1b LB: > { %4382 = sst [smem:[#allocation17_spill]] %s3602_s23  ;;  %s3748_s2 = sadd.s32 4294967295, %s3606_s24   ;;  %s3606_s24 = sphi %s3735_s24, %s4434_s24   ;;  %s3602_s23 = sphi %s3733_s23, %s4436_s23   ;;  %s3598_s22 = sphi %s3731_s22, %s4438_s22   ;;  %s3594_s1 = sphi %s3729_s1, %s4437_s1  }
  0x1c   : > { %s3751_s25 = sadd.s32 1, %s3606_s24   ;;  %s129_s26 = sadd.s32 1, %s3602_s23 }
  0x1d   : > { %4383 = sst [smem:[#allocation18_spill]] %s3751_s25  ;;  %s126_s3 = ssub.s32 %s3606_s24, %s3751_s25 }
  0x1e   : > { %p127_p0 = scmp.eq.s32.totalorder %s126_s3, 0  ;;  %p136_p1 = scmp.ne.s32.totalorder %s3602_s23, %s3598_s22 }
  0x1f   : > { %p137_p2 = scmp.eq.s32.totalorder %s3606_s24, 0  ;;  %p142_p3 = scmp.ne.s32.totalorder %s3598_s22, %s3594_s1 }
  0x20   : > { %s3761_s27 = scalar_select %p127_p0, %s3602_s23, %s129_s26  }
  0x21   : > { %p3763_p4 = por %p137_p2, %p136_p1  ;;  %p4349_p5 = scmp.eq.s32.totalorder %s3748_s2, 0 }
  0x22   : > { %4384 = sst [smem:[#allocation19_spill]] %s3761_s27  ;;  %p2798_p6 = scmp.ge.s32.totalorder %s3606_s24, 1 }
  0x23   : > { %p544_p7 = scmp.lt.s32.totalorder %s3606_s24, 3  ;;  %p3772_p8 = por %p4349_p5, %p142_p3 }
  0x24   : > { %s3608_s30 = smov [#allocation8]   ;;  %p3183_p13 = scmp.lt.s32.totalorder %s3606_s24, 2 }
  0x25   : > { %s4386_s4 = scalar_select %p3772_p8, 1, 0 }
  0x26   : > { %p3777_p10 = pnand %p2798_p6, %p544_p7  ;;  %s568_s0 = sshll.u32 %s3608_s30, 4  ;;  %s569_s0 = int_to_ptr.vmem [resolvable:$true] %s568_s0 }
  0x27   : > { %s3791_s1 = sand.u32 1, %s3602_s23   ;;  %p3796_p0 = pnand %p3183_p13, %p3763_p4 }
  0x28   : > { %s4387_s29 = scalar_select %p3777_p10, 1, 0 }
  0x29   : > { %p3160_p11 = pneg %p3777_p10  ;;  %s4390_s16 = sld [smem:[#allocation35_spill]] }
  0x2a   : > { %s4389_s26 = scalar_select %p3796_p0, 1, 0 }
  0x2b   : > { %p3785_p12 = pnand %p3160_p11, %p4349_p5 }
  0x2d   : > { %s4388_s21 = scalar_select %p3785_p12, 1, 0 }
  0x2e   : > { %p3808_p2 = pneg %p3785_p12 }
  0x2f   : > { %s3386_s25 = scalar_lea.hbm %s4390_s16, 1024 }
  0x30   : > { %p3387_p1 = scmp.ne.s32.totalorder %s4390_s16, %s3386_s25  ;;  %p3393_p6 = scmp.lt.u32.totalorder %s3386_s25, %s4390_s16 }
  0x31   : > { %s4391_s14 = scalar_select %p3808_p2, 1, 0 }
  0x32   : > { %p3389_p3 = pnand %p3808_p2, %p3387_p1 }
  0x34   : > { %p3390_p4 = pneg %p3389_p3 }
  0x36   : > { %p3395_p7 = pnand %p3393_p6, %p3390_p4 }
  0x38   : > { %3398 = shalt.err (!%p3395_p7)
}
  0x39   : > { %s3399_s27 = scalar_lea.vmem %s569_s0, 1024  ;;  %p3407_p5 = scmp.lt.s32.totalorder %s569_s0, %s569_s0 }
  0x3a   : > { %p3400_p11 = scmp.ne.s32.totalorder %s569_s0, %s3399_s27  ;;  %p3408_p8 = scmp.lt.s32.totalorder %s3399_s27, %s3399_s27 }
  0x3c   : > { %p3402_p13 = pnand %p3400_p11, %p3808_p2  ;;  %p3409_p10 = por %p3408_p8, %p3407_p5 }
  0x3e   : > { %p3403_p9 = pneg %p3402_p13 }
  0x40   : > { %p3410_p0 = pnand %p3409_p10, %p3403_p9 }
  0x42   : > { %3413 = shalt.err (!%p3410_p0)
}
  0x43   : > { %s4359_s19 = smov 64   ;;  %s3610_s20 = smov 4  }
  0x44   : > { %3163 = dma.hbm_to_vmem [thread:$0]  (!%p3785_p12), %s4390_s16, 1024, %s569_s0, [#allocation9], %s4359_s19, %s4359_s19, %s3610_s20  }
  0x45   : > { %s2804_s30 = sshll.u32 %s3791_s1, 6  ;;  %s2933_s28 = sshll.u32 %s3606_s24, 10 }
  0x46   : > { %s4392_s12 = sld [smem:[#allocation31_spill]]  ;;  %s681_s11 = scalar_lea.vmem [#allocation5], %s2804_s30 }
  0x47   : > { %s688_s10 = sshll.u32 %s681_s11, 4  ;;  %s3611_s9 = smov [#allocation10]   ;;  %s3834_s10 = int_to_ptr.vmem [resolvable:$true] %s688_s10 }
  0x48   : > { %s3836_s8 = sshll.u32 %s3611_s9, 4  ;;  %s4393_s25 = sand.u32 1, %s3606_s24   ;;  %s583_s8 = int_to_ptr.vmem [resolvable:$true] %s3836_s8 }
  0x49   : > { %s3840_s0 = scalar_lea.sflag [#allocation6], %s4393_s25  ;;  %p4394_p8 = scmp.ne.s32.totalorder %s4389_s26, 0 }
  0x4b   : > { %p3846_p9 = pneg %p4394_p8 }
  0x4c   : > { %s3832_s13 = scalar_lea.hbm %s4392_s12, %s2933_s28  ;;  %s3419_s28 = scalar_lea.hbm %s4392_s12, 2048 }
  0x4d   : > { %s3414_s3 = scalar_lea.hbm %s3832_s13, 1024  ;;  %p3420_p1 = scmp.lt.u32.totalorder %s3832_s13, %s4392_s12 }
  0x4e   : > { %p3415_p5 = scmp.ne.s32.totalorder %s3832_s13, %s3414_s3  ;;  %p3421_p3 = scmp.lt.u32.totalorder %s3419_s28, %s3414_s3 }
  0x4f   : > { %s4395_s23 = scalar_select %p3846_p9, 1, 0 }
  0x50   : > { %p3417_p10 = pnand %p3846_p9, %p3415_p5  ;;  %p3422_p4 = por %p3421_p3, %p3420_p1 }
  0x51   : > { %p3423_p6 = scmp.lt.u32.totalorder %s3414_s3, %s3832_s13 }
  0x52   : > { %p3418_p0 = pneg %p3417_p10 }
  0x53   : > { %p3424_p7 = por %p3423_p6, %p3422_p4 }
  0x55   : > { %p3425_p11 = pnand %p3424_p7, %p3418_p0 }
  0x57   : > { %3428 = shalt.err (!%p3425_p11)
}
  0x58   : > { %s3429_s25 = scalar_lea.vmem %s3834_s10, 1024  ;;  %s3612_s11 = smov [#allocation5]  }
  0x59   : > { %p3430_p13 = scmp.ne.s32.totalorder %s3834_s10, %s3429_s25  ;;  %s3434_s30 = sshll.u32 %s3612_s11, 4  ;;  %s3435_s30 = int_to_ptr.vmem [resolvable:$false] %s3434_s30 }
  0x5a   : > { %s3436_s9 = scalar_lea.vmem %s3435_s30, 2048  ;;  %p3437_p12 = scmp.lt.s32.totalorder %s3834_s10, %s3435_s30 }
  0x5b   : > { %p3432_p5 = pnand %p3430_p13, %p3846_p9  ;;  %p3438_p2 = scmp.lt.s32.totalorder %s3436_s9, %s3429_s25 }
  0x5d   : > { %p3433_p10 = pneg %p3432_p5  ;;  %p3439_p1 = por %p3438_p2, %p3437_p12 }
  0x5f   : > { %p3440_p3 = pnand %p3439_p1, %p3433_p10 }
  0x61   : > { %3443 = shalt.err (!%p3440_p3)
}
  0x62   : > { %3176 = dma.hbm_to_vmem [thread:$0]  (!%p4394_p8), %s3832_s13, 1024, %s3834_s10, %s3840_s0, %s4359_s19, %s4359_s19, %s3610_s20  }
  0x63   : > { %s4396_s17 = sld [smem:[#allocation36_spill]]  ;;  %p4397_p2 = scmp.ne.s32.totalorder %s4391_s14, 0 }
  0x69   : > { %s3444_s27 = scalar_lea.hbm %s4396_s17, 16 }
  0x6a   : > { %p3445_p12 = scmp.ne.s32.totalorder %s4396_s17, %s3444_s27  ;;  %p3451_p6 = scmp.lt.u32.totalorder %s3444_s27, %s4396_s17 }
  0x6c   : > { %p3447_p0 = pnand %p3445_p12, %p4397_p2 }
  0x6e   : > { %p3448_p4 = pneg %p3447_p0 }
  0x70   : > { %p3453_p7 = pnand %p3451_p6, %p3448_p4 }
  0x72   : > { %3456 = shalt.err (!%p3453_p7)
}
  0x73   : > { %s3457_s12 = scalar_lea.vmem %s583_s8, 16  ;;  %s3464_s10 = scalar_lea.vmem %s583_s8, 32 }
  0x74   : > { %p3458_p11 = scmp.ne.s32.totalorder %s583_s8, %s3457_s12  ;;  %p3465_p10 = scmp.lt.s32.totalorder %s583_s8, %s583_s8 }
  0x75   : > { %p3466_p1 = scmp.lt.s32.totalorder %s3464_s10, %s3457_s12 }
  0x76   : > { %p3460_p13 = pnand %p3458_p11, %p4397_p2 }
  0x77   : > { %p3467_p3 = por %p3466_p1, %p3465_p10 }
  0x78   : > { %p3461_p5 = pneg %p3460_p13 }
  0x7a   : > { %p3468_p8 = pnand %p3467_p3, %p3461_p5 }
  0x7c   : > { %3471 = shalt.err (!%p3468_p8)
}
  0x7d   : > { %p4398_p12 = scmp.ne.s32.totalorder %s4388_s21, 0  ;;  %s3613_s28 = smov [#allocation11]  }
  0x7e   : > { %s592_s27 = sshll.u32 %s3613_s28, 4  ;;  %s3138_s25 = smul.u32 384, %s3791_s1  ;;  %s593_s27 = int_to_ptr.vmem [resolvable:$true] %s592_s27 }
  0x7f   : > { %3166 = dma.hbm_to_vmem [thread:$0]  (!%p4398_p12), %s4396_s17, 16, %s583_s8, [#allocation9]  }
  0x80   : > { %s3472_s9 = scalar_lea.hbm %s4342_s18, 1024 }
  0x81   : > { %p3473_p8 = scmp.ne.s32.totalorder %s4342_s18, %s3472_s9  ;;  %p3479_p6 = scmp.lt.u32.totalorder %s3472_s9, %s4342_s18 }
  0x83   : > { %p3475_p0 = pnand %p3473_p8, %p4397_p2 }
  0x85   : > { %p3476_p4 = pneg %p3475_p0 }
  0x87   : > { %p3481_p7 = pnand %p3479_p6, %p3476_p4 }
  0x89   : > { %3484 = shalt.err (!%p3481_p7)
}
  0x8a   : > { %s3485_s8 = scalar_lea.vmem %s593_s27, 1024  ;;  %p3493_p10 = scmp.lt.s32.totalorder %s593_s27, %s593_s27 }
  0x8b   : > { %p3486_p11 = scmp.ne.s32.totalorder %s593_s27, %s3485_s8  ;;  %p3494_p1 = scmp.lt.s32.totalorder %s3485_s8, %s3485_s8 }
  0x8d   : > { %p3488_p13 = pnand %p3486_p11, %p4397_p2  ;;  %p3495_p3 = por %p3494_p1, %p3493_p10 }
  0x8f   : > { %p3489_p5 = pneg %p3488_p13 }
  0x91   : > { %p3496_p9 = pnand %p3495_p3, %p3489_p5 }
  0x93   : > { %3499 = shalt.err (!%p3496_p9)
}
  0x94   : > { %s4399_s3 = smov 64   ;;  %s3139_s14 = smul.u32 6144, %s3606_s24 }
  0x95   : > { %3169 = dma.hbm_to_vmem [thread:$0]  (!%p4398_p12), %s4342_s18, 1024, %s593_s27, [#allocation12], %s4399_s3, %s4399_s3, %s3610_s20  }
  0x96   : > { %s613_s11 = scalar_lea.vmem [#allocation3], %s3138_s25  ;;  %s4400_s10 = sld [smem:[#allocation24_spill]] }
  0x97   : > { %s620_s30 = sshll.u32 %s613_s11, 4  ;;  %s610_s21 = scalar_lea.sflag [#allocation4], %s3791_s1  ;;  %s3920_s30 = int_to_ptr.vmem [resolvable:$true] %s620_s30 }
  0x98   : > { %p4401_p2 = scmp.ne.s32.totalorder %s4395_s23, 0 }
  0x9c   : > { %s3918_s13 = scalar_lea.hbm %s4400_s10, %s3139_s14  ;;  %s3505_s25 = scalar_lea.hbm %s4400_s10, 12288 }
  0x9d   : > { %s3500_s8 = scalar_lea.hbm %s3918_s13, 6144  ;;  %p3506_p0 = scmp.lt.u32.totalorder %s3918_s13, %s4400_s10 }
  0x9e   : > { %p3501_p9 = scmp.ne.s32.totalorder %s3918_s13, %s3500_s8  ;;  %p3507_p4 = scmp.lt.u32.totalorder %s3505_s25, %s3500_s8 }
  0x9f   : > { %p3509_p7 = scmp.lt.u32.totalorder %s3500_s8, %s3918_s13 }
  0xa0   : > { %p3503_p8 = pnand %p3501_p9, %p4401_p2  ;;  %p3508_p6 = por %p3507_p4, %p3506_p0 }
  0xa2   : > { %p3504_p12 = pneg %p3503_p8  ;;  %p3510_p11 = por %p3509_p7, %p3508_p6 }
  0xa4   : > { %p3511_p13 = pnand %p3510_p11, %p3504_p12 }
  0xa6   : > { %3514 = shalt.err (!%p3511_p13)
}
  0xa7   : > { %s3515_s28 = scalar_lea.vmem %s3920_s30, 6144  ;;  %s3614_s14 = smov [#allocation3]  }
  0xa8   : > { %p3516_p5 = scmp.ne.s32.totalorder %s3920_s30, %s3515_s28  ;;  %s3520_s11 = sshll.u32 %s3614_s14, 4  ;;  %s3521_s11 = int_to_ptr.vmem [resolvable:$false] %s3520_s11 }
  0xa9   : > { %s3522_s9 = scalar_lea.vmem %s3521_s11, 12288  ;;  %p3523_p3 = scmp.lt.s32.totalorder %s3920_s30, %s3521_s11 }
  0xaa   : > { %p3518_p10 = pnand %p3516_p5, %p4401_p2  ;;  %p3524_p9 = scmp.lt.s32.totalorder %s3522_s9, %s3515_s28 }
  0xac   : > { %p3519_p1 = pneg %p3518_p10  ;;  %p3525_p8 = por %p3524_p9, %p3523_p3 }
  0xae   : > { %p3526_p0 = pnand %p3525_p8, %p3519_p1 }
  0xb0   : > { %3529 = shalt.err (!%p3526_p0)
}
  0xb1   : > { %s3615_s12 = smov 384   ;;  %s3616_s8 = smov 24  }
  0xb2   : > { %p4402_p12 = scmp.ne.s32.totalorder %s4389_s26, 0  ;;  %s2807_s20 = sshll.u32 %s3606_s24, 4 }
  0xb3   : > { %s713_s27 = scalar_lea.vmem [#allocation7], %s3791_s1  ;;  %s4403_s15 = sld [smem:[#allocation34_spill]] }
  0xb4   : > { %3173 = dma.hbm_to_vmem [thread:$0]  (!%p4402_p12), %s3918_s13, 6144, %s3920_s30, %s610_s21, %s3615_s12, %s3615_s12, %s3616_s8  }
  0xb5   : > { %s720_s25 = sshll.u32 %s713_s27, 4  ;;  %s721_s25 = int_to_ptr.vmem [resolvable:$true] %s720_s25 }
  0xb9   : > { %s718_s28 = scalar_lea.hbm %s4403_s15, %s2807_s20  ;;  %s3535_s10 = scalar_lea.hbm %s4403_s15, 32 }
  0xba   : > { %s3530_s14 = scalar_lea.hbm %s718_s28, 16  ;;  %p3536_p11 = scmp.lt.u32.totalorder %s718_s28, %s4403_s15 }
  0xbb   : > { %p3531_p4 = scmp.ne.s32.totalorder %s718_s28, %s3530_s14  ;;  %p3537_p13 = scmp.lt.u32.totalorder %s3535_s10, %s3530_s14 }
  0xbc   : > { %p3539_p10 = scmp.lt.u32.totalorder %s3530_s14, %s718_s28 }
  0xbd   : > { %p3533_p6 = pnand %p3531_p4, %p4401_p2  ;;  %p3538_p5 = por %p3537_p13, %p3536_p11 }
  0xbf   : > { %p3534_p7 = pneg %p3533_p6  ;;  %p3540_p1 = por %p3539_p10, %p3538_p5 }
  0xc1   : > { %p3541_p3 = pnand %p3540_p1, %p3534_p7 }
  0xc3   : > { %3544 = shalt.err (!%p3541_p3)
}
  0xc4   : > { %s3545_s24 = scalar_lea.vmem %s721_s25, 16  ;;  %s3617_s1 = smov [#allocation7]  }
  0xc5   : > { %p3546_p9 = scmp.ne.s32.totalorder %s721_s25, %s3545_s24  ;;  %s3550_s30 = sshll.u32 %s3617_s1, 4  ;;  %s3551_s30 = int_to_ptr.vmem [resolvable:$false] %s3550_s30 }
  0xc6   : > { %s3552_s13 = scalar_lea.vmem %s3551_s30, 32  ;;  %p3553_p4 = scmp.lt.s32.totalorder %s721_s25, %s3551_s30 }
  0xc7   : > { %p3548_p8 = pnand %p3546_p9, %p4401_p2  ;;  %p3554_p6 = scmp.lt.s32.totalorder %s3552_s13, %s3545_s24 }
  0xc9   : > { %p3549_p0 = pneg %p3548_p8  ;;  %p3555_p12 = por %p3554_p6, %p3553_p4 }
  0xcb   : > { %p3556_p11 = pnand %p3555_p12, %p3549_p0 }
  0xcd   : > { %3559 = shalt.err (!%p3556_p11)
}
  0xce   : > { %p4404_p13 = scmp.ne.s32.totalorder %s4389_s26, 0  ;;  %p4405_p7 = scmp.ne.s32.totalorder %s4387_s29, 0 }
  0xcf   : > { %s3967_s16 = sand.u32 (!%p4405_p7), 1, %s3598_s22   ;;  %p4406_p2 = scmp.ne.s32.totalorder (!%p4405_p7), %s4386_s4, 0 }
  0xd0   : > { %3179 = dma.hbm_to_vmem [thread:$0]  (!%p4404_p13), %s718_s28, 16, %s721_s25, %s3840_s0  }
  0xd1   : > { %729 = sbr.rel (%p4405_p7) target bundleno = 3452 (0xd7c), region = 100  ;;  %s732_s23 = scalar_lea.sflag (!%p4405_p7), [#allocation4], %s3967_s16 }
  0xd2   : > { %s3140_s17 = smul.u32 (!%p4405_p7), 384, %s3967_s16 }
  0xd4   : > { %s3971_s10 = scalar_lea.vmem (!%p4405_p7), [#allocation3], %s3140_s17 }
  0xd8   : > { %3577 = dma.done.wait (%p4406_p2), %s732_s23, 6144  }
  0xd9   : > { %3579 = vsyncadd (%p4406_p2), %s732_s23, 4294961152  ;;  %s740_s29 = sand.u32 1, %s3748_s2   ;;  %s2809_s26 = sshll.u32 %s3967_s16, 6 }
  0xda   : > { %s741_s0 = scalar_lea.sflag [#allocation6], %s740_s29  ;;  %s3979_s21 = scalar_lea.vmem [#allocation5], %s2809_s26 }
  0xdb   : > { %3581 = dma.done.wait (%p4406_p2), %s741_s0, 1040  }
  0xdc   : > { %3583 = vsyncadd (%p4406_p2), %s741_s0, 4294966256  ;;  %p4407_p12 = scmp.eq.s32.totalorder %s3748_s2, 0 }
  0xde   : > { %3585 = dma.done.wait (%p4407_p12), [#allocation9], 1040   ;;  %p4408_p5 = pmov %p4407_p12 }
  0xe0   : > { %3587 = vsyncadd (%p4408_p5), [#allocation9], 4294966256  ;;  %p4409_p10 = pmov %p4408_p5 }
  0xe1   : > { %p4410_p1 = pmov %p4408_p5 }
  0xe2   : > { %3589 = dma.done.wait (%p4409_p10), [#allocation12], 1024  }
  0xe3   : > { %3591 = vsyncadd (%p4410_p1), [#allocation12], 4294966272  ;;  %p857_p3 = scmp.lt.s32.totalorder %s3748_s2, 1  ;;  %s4411_s6 = sld [smem:[#allocation26_spill]] }
  0xe4   : > { %s4412_s5 = sld [smem:[#allocation25_spill]]  ;;  %s4414_s26 = sld [smem:[#allocation28_spill]] }
  0xe5   : > { %s3996_s8 = scalar_select %p857_p3, %s3748_s2, 1 }
  0xe6   : > { %s4415_s12 = sld [smem:[#allocation29_spill]]  ;;  %s4416_s14 = sld [smem:[#allocation30_spill]] }
  0xe7   : > { %s3141_s4 = smul.u32 6, %s3996_s8  ;;  %s2934_s20 = sshll.u32 %s3996_s8, 7 }
  0xe8   : > { %s2935_s27 = sshll.u32 %s3996_s8, 6  ;;  %s4418_s13 = sld [smem:[#allocation33_spill]] }
  0xe9   : > { %s4003_s3 = scalar_lea.vmem %s4411_s6, %s2934_s20  ;;  %p4419_p9 = scmp.ne.s32.totalorder %s3748_s2, 0 }
  0xea   : > { %s4012_s24 = scalar_lea.vmem %s4412_s5, %s3141_s4  ;;  %s874_s0 = scalar_lea.vmem %s4414_s26, %s3996_s8 }
  0xeb   : > { %s4417_s5 = sld [smem:[#allocation32_spill]]  ;;  %893 = sbr.rel (%p4419_p9) target bundleno = 418 (0x1a2), region = 128 }
  0xec   : > { %s4026_s6 = scalar_lea.vmem %s4415_s12, %s2935_s27  ;;  %s882_s11 = scalar_lea.vmem %s4416_s14, %s3996_s8 }
  0xed   : > { %s4420_s26 = sld [smem:[#allocation20_spill]] (!%p4419_p9)  ;;  %s4421_s20 = sld [smem:[#allocation22_spill]] (!%p4419_p9) }
  0xee   : > { %s888_s17 = scalar_lea.vmem %s4418_s13, %s3996_s8  ;;  %s4422_s28 = sld [smem:[#allocation23_spill]] (!%p4419_p9) }
  0xf1   : > { %s885_s15 = scalar_lea.vmem %s4417_s5, %s3996_s8 }
  0xf3   : > { %v894_v0 = vld [vmem:[%s4420_s26] sm:$0xff]  ;;  %v895_v1 = vld [vmem:[%s4420_s26 + $0x8] sm:$0xff] }
  0xf4   : > { %898 = vadd.xlane.f32.xlu0 %v894_v0  ;;  %v904_v2 = vmul.f32 %v894_v0, %v894_v0  ;;  %v905_v3 = vmul.f32 %v895_v1, %v895_v1  ;;  %v2818_v22 = vld [vmem:[%s4421_s20] ss:$0 sm:$0xff] }
  0xf5   : > { %v2819_v24 = vld [vmem:[%s4422_s28] ss:$0 sm:$0xff] }
  0xf6   : > { %906 = vadd.xlane.f32.xlu1 %v904_v2 }
  0xf8   : > { %900 = vadd.xlane.f32.xlu0 %v895_v1 }
  0xfa   : > { %908 = vadd.xlane.f32.xlu1 %v905_v3 }
 0x181   : > { %v899_v4 = vpop.xlane.xlu0 %898 }
 0x182   : > { %v902_v5 = vmul.f32 0.03125, %v899_v4 }
 0x183   : > { %v907_v6 = vpop.xlane.xlu1 %906 }
 0x184   : > { %v912_v7 = vmul.f32 %v902_v5, %v902_v5  ;;  %v910_v8 = vmul.f32 0.03125, %v907_v6  ;;  %v918_v20 = vsub.f32 %v894_v0, %v902_v5 }
 0x185   : > { %v901_v9 = vpop.xlane.xlu0 %900 }
 0x186   : > { %v914_v10 = vsub.f32 %v910_v8, %v912_v7  ;;  %v903_v11 = vmul.f32 0.03125, %v901_v9 }
 0x187   : > { %v909_v12 = vpop.xlane.xlu1 %908 }
 0x188   : > { %v916_v13 = vmax.f32 %v914_v10, 0.0  ;;  %v913_v14 = vmul.f32 %v903_v11, %v903_v11  ;;  %v911_v15 = vmul.f32 0.03125, %v909_v12  ;;  %v919_v26 = vsub.f32 %v895_v1, %v903_v11 }
 0x18a   : > { %v920_v16 = vadd.f32 1e-12, %v916_v13  ;;  %v915_v17 = vsub.f32 %v911_v15, %v913_v14 }
 0x18c   : > { %3232 = vrsqrt.f32 %v920_v16  ;;  %v917_v18 = vmax.f32 %v915_v17, 0.0 }
 0x18e   : > { %v921_v19 = vadd.f32 1e-12, %v917_v18 }
 0x190   : > { %3234 = vrsqrt.f32 %v921_v19 }
 0x196   : > { %v3233_v21 = vpop.eup %3232 }
 0x197   : > { %v924_v23 = vmul.f32 %v3233_v21, %v918_v20 }
 0x199   : > { %v932_v25 = vmul.f32 %v2818_v22, %v924_v23 }
 0x19a   : > { %v3235_v27 = vpop.eup %3234 }
 0x19b   : > { %v940_v28 = vadd.f32 %v2819_v24, %v932_v25  ;;  %v925_v29 = vmul.f32 %v3235_v27, %v919_v26 }
 0x19d   : > { %942 = vst [vmem:[#allocation2] sm:$0xff] %v940_v28  ;;  %v933_v30 = vmul.f32 %v2818_v22, %v925_v29 }
 0x19f   : > { %v941_v31 = vadd.f32 %v2819_v24, %v933_v30 }
 0x1a1   : > { %943 = vst [vmem:[#allocation2 + $0x8] sm:$0xff] %v941_v31 }
 0x1a2 PF: > { %v3236_v32 = vld [vmem:[%s3971_s10 + $0xc] ss:$24 sps:$4 sm:$0xff]   ;;  %v3238_v33 = vld [vmem:[%s3971_s10 + $0x8] ss:$24 sps:$4 sm:$0xff]   ;;  %v3618_v34 = vmov 0   ;;  %v3619_v4 = vmov 0.0   ;;  %v997_v5 = vlaneseq  ;;  %s4424_s1 = scalar_lea.vmem %s4331_s7, %s3996_s8 }
 0x1a3   : > { %1342 = vmatprep.mubr.bf16.mxu1 %v3618_v34  ;;  %1299 = vmatprep.mubr.bf16.mxu0 %v3618_v34  ;;  %v3239_v35 = vld [vmem:[%s3971_s10 + $0x4] ss:$24 sps:$4 sm:$0xff]   ;;  %v3243_v37 = vld [vmem:[%s3971_s10] ss:$24 sps:$4 sm:$0xff]   ;;  %v3245_v39 = vld [vmem:[%s3971_s10 + $0x34] ss:$24 sps:$4 sm:$0xff]  }
 0x1a4   : > { %1310 = vmatprep.subr.bf16.mxu1 %v3236_v32  ;;  %v3241_v36 = vld [vmem:[%s3971_s10 + $0x3c] ss:$24 sps:$4 sm:$0xff]   ;;  %v3244_v38 = vld [vmem:[%s3971_s10 + $0x38] ss:$24 sps:$4 sm:$0xff]   ;;  %1267 = vmatprep.subr.bf16.mxu0 %v3239_v35  ;;  %v3247_v40 = vld [vmem:[%s3971_s10 + $0x6c] ss:$24 sps:$4 sm:$0xff]  }
 0x1a5   : > { %1311 = vmatpush1.bf16.msra.mxu1 %v3238_v33  ;;  %1268 = vmatpush1.bf16.msra.mxu0 %v3243_v37  ;;  %v3249_v41 = vld [vmem:[%s3971_s10 + $0x30] ss:$24 sps:$4 sm:$0xff]   ;;  %v3251_v43 = vld [vmem:[%s3971_s10 + $0x64] ss:$24 sps:$4 sm:$0xff]   ;;  %v3255_v45 = vld [vmem:[%s3971_s10 + $0x60] ss:$24 sps:$4 sm:$0xff]  }
 0x1a6   : > { %1312 = vmatprep.subr.bf16.mxu1 %v3241_v36  ;;  %1269 = vmatprep.subr.bf16.mxu0 %v3245_v39  ;;  %v3250_v42 = vld [vmem:[%s3971_s10 + $0x68] ss:$24 sps:$4 sm:$0xff]   ;;  %v3253_v44 = vld [vmem:[%s3971_s10 + $0x9c] ss:$24 sps:$4 sm:$0xff]   ;;  %v3256_v47 = vld [vmem:[%s3971_s10 + $0x98] ss:$24 sps:$4 sm:$0xff]  }
 0x1a7   : > { %v3257_v46 = vld [vmem:[%s3971_s10 + $0x94] ss:$24 sps:$4 sm:$0xff]   ;;  %v3261_v49 = vld [vmem:[%s3971_s10 + $0x90] ss:$24 sps:$4 sm:$0xff]   ;;  %v3263_v50 = vld [vmem:[%s3971_s10 + $0xc4] ss:$24 sps:$4 sm:$0xff]  }
 0x1a8   : > { %v3259_v48 = vld [vmem:[%s3971_s10 + $0xcc] ss:$24 sps:$4 sm:$0xff]   ;;  %v3262_v51 = vld [vmem:[%s3971_s10 + $0xc8] ss:$24 sps:$4 sm:$0xff]   ;;  %v3265_v52 = vld [vmem:[%s3971_s10 + $0xfc] ss:$24 sps:$4 sm:$0xff]  }
 0x1a9   : > { %1313 = vmatpush1.bf16.msra.mxu1 %v3244_v38  ;;  %1270 = vmatpush1.bf16.msra.mxu0 %v3249_v41  ;;  %v3267_v53 = vld [vmem:[%s3971_s10 + $0xc0] ss:$24 sps:$4 sm:$0xff]   ;;  %v3269_v54 = vld [vmem:[%s3971_s10 + $0xf4] ss:$24 sps:$4 sm:$0xff]   ;;  %v3273_v57 = vld [vmem:[%s3971_s10 + $0xf0] ss:$24 sps:$4 sm:$0xff]  }
 0x1aa   : > { %1314 = vmatprep.subr.bf16.mxu1 %v3247_v40  ;;  %1271 = vmatprep.subr.bf16.mxu0 %v3251_v43  ;;  %v3268_v55 = vld [vmem:[%s3971_s10 + $0xf8] ss:$24 sps:$4 sm:$0xff]   ;;  %v3271_v56 = vld [vmem:[%s3971_s10 + $0x12c] ss:$24 sps:$4 sm:$0xff]   ;;  %v3274_v58 = vld [vmem:[%s3971_s10 + $0x128] ss:$24 sps:$4 sm:$0xff]  }
 0x1ab   : > { %v3275_v59 = vld [vmem:[%s3971_s10 + $0x124] ss:$24 sps:$4 sm:$0xff]   ;;  %v3279_v61 = vld [vmem:[%s3971_s10 + $0x120] ss:$24 sps:$4 sm:$0xff]   ;;  %v3281_v62 = vld [vmem:[%s3971_s10 + $0x154] ss:$24 sps:$4 sm:$0xff]  }
 0x1ac   : > { %v3277_v60 = vld [vmem:[%s3971_s10 + $0x15c] ss:$24 sps:$4 sm:$0xff]   ;;  %v3280_v63 = vld [vmem:[%s3971_s10 + $0x158] ss:$24 sps:$4 sm:$0xff]   ;;  %vm3620_vm0 = vmmov 0   ;;  %v4102_v6 = vshrl.u32 %v997_v5, 7 }
 0x1ad   : > { %1315 = vmatpush1.bf16.msra.mxu1 %v3250_v42  ;;  %1272 = vmatpush1.bf16.msra.mxu0 %v3255_v45  ;;  %v4087_v0 = vld [vmem:[#allocation2] sm:$0xff]  ;;  %v4089_v1 = vld [vmem:[#allocation2 + $0x8] sm:$0xff]  ;;  %s4423_s9 = sld [smem:[#allocation21_spill]]  ;;  %vm1520_vm1 = vcmask 64512   ;;  %vm1548_vm2 = vcmask 1043456   ;;  %s4425_s13 = sld [smem:[#allocation27_spill]] }
 0x1ae   : > { %1316 = vmatprep.subr.bf16.mxu1 %v3253_v44  ;;  %1273 = vmatprep.subr.bf16.mxu0 %v3257_v46  ;;  %v3283_v2 = vld [vmem:[%s3971_s10 + $0x150] ss:$24 sps:$4 sm:$0xff]   ;;  %v4094_v3 = vpack.c.bf16 %v4089_v1, %v4087_v0  ;;  %v1007_v7 = vsub.s32 2, %v4102_v6  ;;  %v4109_v9 = vsub.s32 0, %v4102_v6  ;;  %v3286_v29 = vld [vmem:[%s3971_s10 + $0x14] ss:$24 sps:$4 sm:$0xff]  }
 0x1af   : > { %v4106_v8 = vld [vmem:[%s4012_s24] sm:$0x3f]  ;;  %v3289_v30 = vld [vmem:[%s3971_s10 + $0x44] ss:$24 sps:$4 sm:$0xff]   ;;  %v3287_v31 = vld [vmem:[%s3971_s10 + $0x40] ss:$24 sps:$4 sm:$0xff]  }
 0x1b0   : > { %v1008_v10 = vrot.slane %v4106_v8, %v1007_v7  ;;  %v1000_v12 = vrot.slane %v4106_v8, %v4109_v9  ;;  %v3284_v28 = vld [vmem:[%s3971_s10 + $0x10] ss:$24 sps:$4 sm:$0xff]   ;;  %v3292_v32 = vld [vmem:[%s3971_s10 + $0x74] ss:$24 sps:$4 sm:$0xff]   ;;  %v3293_v35 = vld [vmem:[%s3971_s10 + $0xa0] ss:$24 sps:$4 sm:$0xff]  }
 0x1b1   : > { %1317 = vmatpush1.bf16.msra.mxu1 %v3256_v47  ;;  %1274 = vmatpush1.bf16.msra.mxu0 %v3261_v49  ;;  %v3290_v33 = vld [vmem:[%s3971_s10 + $0x70] ss:$24 sps:$4 sm:$0xff]   ;;  %v3298_v36 = vld [vmem:[%s3971_s10 + $0xd4] ss:$24 sps:$4 sm:$0xff]   ;;  %v3301_v38 = vld [vmem:[%s3971_s10 + $0x104] ss:$24 sps:$4 sm:$0xff]  }
 0x1b2   : > { %1318 = vmatprep.subr.bf16.mxu1 %v3259_v48  ;;  %1275 = vmatprep.subr.bf16.mxu0 %v3263_v50  ;;  %v3296_v37 = vld [vmem:[%s3971_s10 + $0xd0] ss:$24 sps:$4 sm:$0xff]   ;;  %v3299_v39 = vld [vmem:[%s3971_s10 + $0x100] ss:$24 sps:$4 sm:$0xff]   ;;  %v3304_v40 = vld [vmem:[%s3971_s10 + $0x134] ss:$24 sps:$4 sm:$0xff]  }
 0x1b3   : > { %v3302_v41 = vld [vmem:[%s3971_s10 + $0x130] ss:$24 sps:$4 sm:$0xff]   ;;  %v3307_v42 = vld [vmem:[%s3971_s10 + $0x164] ss:$24 sps:$4 sm:$0xff]   ;;  %v3305_v43 = vld [vmem:[%s3971_s10 + $0x160] ss:$24 sps:$4 sm:$0xff]   ;;  %s4426_s23 = scalar_lea.vmem %s4425_s13, %s3996_s8 }
 0x1b4   : > { %v3621_v44 = vmov 1966171168   ;;  %v2868_v48 = vld.sshfl [vmem:[%s4423_s9] sm:$0x11 pattern:$0x75316420] }
 0x1b5   : > { %1319 = vmatpush1.bf16.msra.mxu1 %v3262_v51  ;;  %1276 = vmatpush1.bf16.msra.mxu0 %v3267_v53  ;;  %v1407_v45 = vunpack.c.l.s4 %v3621_v44  ;;  %v1405_v50 = vcombine.high %v2868_v48, %v2868_v48  ;;  %s4431_s28 = scalar_lea.vmem [#allocation7], %s3967_s16  ;;  %p2912_p8 = scmp.ne.s32.totalorder %s3748_s2, 1 }
 0x1b6   : > { %1320 = vmatprep.subr.bf16.mxu1 %v3265_v52  ;;  %1277 = vmatprep.subr.bf16.mxu0 %v3269_v54  ;;  %vm3623_vm3 = vmmov (!%p2912_p8), 0   ;;  %vm2371_vm4 = vcmask (!%p2912_p8), 1040384   ;;  %s4432_s8 = sld [smem:[#allocation37_spill]] (!%p2912_p8)  ;;  %s4433_s4 = sld [smem:[#allocation38_spill]] (!%p2912_p8) }
 0x1b7   : > { %v1408_v46 = vunpack.c.0.s8 %v1407_v45 }
 0x1b9   : > { %1321 = vmatpush1.bf16.msra.mxu1 %v3268_v55  ;;  %1278 = vmatpush1.bf16.msra.mxu0 %v3273_v57  ;;  %v1411_v47 = vsub.s32 %v1408_v46, %v4102_v6  ;;  %v1011_v46 = vsub.s32 3, %v4102_v6 }
 0x1ba   : > { %1322 = vmatprep.subr.bf16.mxu1 %v3271_v56  ;;  %1279 = vmatprep.subr.bf16.mxu0 %v3275_v59 }
 0x1bb   : > { %v1412_v49 = vrot.slane %v2868_v48, %v1411_v47 }
 0x1bd   : > { %1323 = vmatpush1.bf16.msra.mxu1 %v3274_v58  ;;  %1280 = vmatpush1.bf16.msra.mxu0 %v3279_v61  ;;  %v4150_v51 = vrot.slane %v1412_v49, %v4109_v9  ;;  %v1419_v58 = vrot.slane %v1405_v50, %v1411_v47  ;;  %v1012_v49 = vrot.slane %v4106_v8, %v1011_v46 }
 0x1be   : > { %1324 = vmatprep.subr.bf16.mxu1 %v3277_v60  ;;  %1281 = vmatprep.subr.bf16.mxu0 %v3281_v62 }
 0x1bf   : > { %v4155_v60 = vrot.slane %v1419_v58, %v4109_v9 }
 0x1c1   : > { %1325 = vmatpush1.bf16.msra.mxu1 %v3280_v63  ;;  %1282 = vmatpush1.bf16.msra.mxu0 %v3283_v2 }
 0x1c2   : > { %3010 = vmatprep.subr.bf16.mxu1 %v3619_v4  ;;  %1353 = vmatprep.subr.bf16.mxu0 %v3286_v29  ;;  %v1019_v29 = vsub.s32 5, %v4102_v6 }
 0x1c4   : > { %1343 = vmatmul.mubr.bf16.vlgmr.msra.gmra.mrb[0].mxu1 %v4094_v3  ;;  %1300 = vmatmul.mubr.bf16.vlgmr.msra.gmra.mrb[0].mxu0 %v4094_v3 }
 0x1c5   : > { %1385 = vmatprep.mubr.bf16.mxu0 %v3618_v34  ;;  %3012 = vmatprep.mubr.msk.bf16.mxu1 %vm3620_vm0, %v3619_v4  ;;  %v3295_v34 = vld [vmem:[%s3971_s10 + $0xa4] ss:$24 sps:$4 sm:$0xff]  }
 0x1c6   : > { %1354 = vmatpush1.bf16.msra.mxu0 %v3284_v28 }
 0x1c7   : > { %1355 = vmatprep.subr.bf16.mxu0 %v3289_v30 }
 0x1ca   : > { %1356 = vmatpush1.bf16.msra.mxu0 %v3287_v31  ;;  %v1020_v31 = vrot.slane %v4106_v8, %v1019_v29 }
 0x1cb   : > { %1357 = vmatprep.subr.bf16.mxu0 %v3292_v32 }
 0x1ce   : > { %1358 = vmatpush1.bf16.msra.mxu0 %v3290_v33 }
 0x1cf   : > { %1359 = vmatprep.subr.bf16.mxu0 %v3295_v34 }
 0x1d2   : > { %1360 = vmatpush1.bf16.msra.mxu0 %v3293_v35 }
 0x1d3   : > { %1361 = vmatprep.subr.bf16.mxu0 %v3298_v36 }
 0x1d6   : > { %1362 = vmatpush1.bf16.msra.mxu0 %v3296_v37 }
 0x1d7   : > { %1363 = vmatprep.subr.bf16.mxu0 %v3301_v38 }
 0x1da   : > { %1364 = vmatpush1.bf16.msra.mxu0 %v3299_v39 }
 0x1db   : > { %1365 = vmatprep.subr.bf16.mxu0 %v3304_v40 }
 0x1de   : > { %1366 = vmatpush1.bf16.msra.mxu0 %v3302_v41 }
 0x1df   : > { %1367 = vmatprep.subr.bf16.mxu0 %v3307_v42 }
 0x1e2   : > { %1368 = vmatpush1.bf16.msra.mxu0 %v3305_v43 }
 0x1e5   : > { %1386 = vmatmul.mubr.bf16.vlgmr.msra.gmra.mrb[4].mxu0 %v4094_v3 }
 0x297   : > { %v1344_v11 = vpop.f32.mrb[0].mxu1  ;;  %v1301_v16 = vpop.f32.mrb[0].mxu0 }
 0x298   : > { %v1345_v13 = vadd.f32 %v1344_v11, %v1008_v10  ;;  %v4114_v14 = vpop.f32.mrb[1].mxu1  ;;  %v4118_v19 = vpop.f32.mrb[1].mxu0  ;;  %v1302_v20 = vadd.f32 %v1301_v16, %v1000_v12 }
 0x299   : > { %v1348_v15 = vpop.f32.mrb[2].mxu1  ;;  %v1305_v21 = vpop.f32.mrb[2].mxu0 }
 0x29a   : > { %v1422_v17 = vpack.c.bf16 %v1345_v13, %v1345_v13  ;;  %v4116_v18 = vpop.f32.mrb[3].mxu1  ;;  %v4120_v22 = vpop.f32.mrb[3].mxu0  ;;  %v1349_v23 = vadd.f32 %v1348_v15, %v1008_v10  ;;  %v1420_v24 = vpack.c.bf16 %v1302_v20, %v1302_v20  ;;  %v1306_v26 = vadd.f32 %v1305_v21, %v1000_v12 }
 0x29b   : > { %v1015_v10 = vsub.s32 4, %v4102_v6 }
 0x29c   : > { %3011 = vmatpush3.bf16.xpose.msra.mxu1 %v1422_v17  ;;  %v1423_v25 = vpack.c.bf16 %v1349_v23, %v1349_v23  ;;  %v1421_v27 = vpack.c.bf16 %v1306_v26, %v1306_v26 }
 0x29d   : > { %3016 = vmatprep.subr.bf16.mxu1 %v3619_v4  ;;  %v1016_v11 = vrot.slane %v4106_v8, %v1015_v10 }
 0x2a3   : > { %3013 = vmatmul.mubr.bf16.vlgmr.msra.gmra.mrb[4].mxu1 %v1420_v24 }
 0x2a4   : > { %3017 = vmatpush3.bf16.xpose.msra.mxu1 %v1423_v25  ;;  %3018 = vmatprep.mubr.msk.bf16.mxu1 %vm3620_vm0, %v3619_v4 }
 0x2a5   : > { %3022 = vmatprep.subr.bf16.mxu1 %v3619_v4 }
 0x2ab   : > { %3019 = vmatmul.mubr.bf16.vlgmr.msra.gmra.mrb[8].mxu1 %v1421_v27 }
 0x2ac   : > { %3024 = vmatprep.mubr.msk.bf16.mxu1 %vm3620_vm0, %v3619_v4 }
 0x2b8   : > { %v1387_v12 = vpop.f32.mrb[4].mxu0 }
 0x2b9   : > { %v1388_v13 = vadd.f32 %v1387_v12, %v1016_v11  ;;  %v1389_v30 = vpop.f32.mrb[5].mxu0 }
 0x2ba   : > { %v1391_v32 = vpop.f32.mrb[6].mxu0  ;;  %v1390_v34 = vadd.f32 %v1389_v30, %v1020_v31 }
 0x2bb   : > { %v1424_v15 = vpack.c.bf16 %v1388_v13, %v1388_v13  ;;  %v1393_v33 = vpop.f32.mrb[7].mxu0  ;;  %v1392_v35 = vadd.f32 %v1391_v32, %v1016_v11 }
 0x2bc   : > { %v1394_v36 = vadd.f32 %v1393_v33, %v1020_v31  ;;  %v1642_v37 = vpack.c.bf16 %v1390_v34, %v1390_v34 }
 0x2bd   : > { %v1550_v9 = vsel %vm1548_vm2, %v1424_v15, 0  ;;  %v1425_v38 = vpack.c.bf16 %v1392_v35, %v1392_v35  ;;  %v3308_v35 = vld [vmem:[%s4003_s3 + $0x40] sm:$0xff]  }
 0x2be   : > { %3023 = vmatpush3.bf16.msra.mxu1 %v1550_v9  ;;  %v1643_v39 = vpack.c.bf16 %v1394_v36, %v1394_v36  ;;  %v1756_v40 = vsel %vm1548_vm2, %v1642_v37, 0  ;;  %v3309_v36 = vld [vmem:[%s4003_s3] sm:$0xff]   ;;  %v3310_v37 = vld [vmem:[%s4003_s3 + $0x48] sm:$0xff]   ;;  %2952 = vmatprep.subr.bf16.mxu0 %v3308_v35 }
 0x2bf   : > { %3028 = vmatprep.subr.bf16.mxu1 %v3619_v4  ;;  %v1596_v41 = vsel %vm1548_vm2, %v1425_v38, 0  ;;  %2953 = vmatpush3.bf16.msra.mxu0 %v3309_v36  ;;  %v3311_v38 = vld [vmem:[%s4003_s3 + $0x8] sm:$0xff]  }
 0x2c0   : > { %v4170_v42 = vsel %vm1548_vm2, %v1643_v39, 0  ;;  %2954 = vmatprep.subr.bf16.mxu0 %v3310_v37  ;;  %v3312_v39 = vld [vmem:[%s4003_s3 + $0x50] sm:$0xff]  }
 0x2c3   : > { %2955 = vmatpush3.bf16.msra.mxu0 %v3311_v38 }
 0x2c4   : > { %2956 = vmatprep.subr.bf16.mxu0 %v3312_v39 }
 0x376   : > { %v1460_v52 = vpop.f32.mrb[4].mxu1 }
 0x377   : > { %v1506_v53 = vmul.f32 0.25, %v1460_v52  ;;  %v3014_v54 = vpop.f32.mrb[5].mxu1  ;;  %v1003_v52 = vsub.s32 1, %v4102_v6 }
 0x378   : > { %v1463_v55 = vpop.f32.mrb[6].mxu1 }
 0x379   : > { %v3015_v56 = vpop.f32.mrb[7].mxu1  ;;  %v1518_v57 = vadd.f32 %v4150_v51, %v1506_v53  ;;  %v1347_v53 = vadd.f32 %v4114_v14, %v1012_v49 }
 0x37a   : > { %v1004_v56 = vrot.slane %v4106_v8, %v1003_v52 }
 0x37b   : > { %v1521_v59 = vsel %vm1520_vm1, %v1518_v57, -inf }
 0x37c   : > { %1522 = vmax.xlane.f32.xlu0 %v1521_v59  ;;  %v1304_v58 = vadd.f32 %v4118_v19, %v1004_v56  ;;  %v1351_v59 = vadd.f32 %v4116_v18, %v1012_v49  ;;  %v1308_v8 = vadd.f32 %v4120_v22, %v1004_v56  ;;  %v3319_v56 = vld [vmem:[%s4003_s3 + $0x28] sm:$0xff]  }
 0x37e   : > { %v1500_v61 = vpop.f32.mrb[8].mxu1  ;;  %v1638_v6 = vpack.c.bf16 %v1304_v58, %v1304_v58  ;;  %v1639_v14 = vpack.c.bf16 %v1308_v8, %v1308_v8  ;;  %v3322_v58 = vld [vmem:[%s4003_s3 + $0x78] sm:$0xff]  }
 0x37f   : > { %v1507_v62 = vmul.f32 0.25, %v1500_v61  ;;  %v3020_v63 = vpop.f32.mrb[9].mxu1  ;;  %v1641_v61 = vpack.c.bf16 %v1351_v59, %v1351_v59  ;;  %v3323_v59 = vld [vmem:[%s4003_s3 + $0x38] sm:$0xff]  }
 0x380   : > { %v1503_v2 = vpop.f32.mrb[10].mxu1 }
 0x381   : > { %v3021_v3 = vpop.f32.mrb[11].mxu1  ;;  %v1519_v5 = vadd.f32 %v4155_v60, %v1507_v62 }
 0x383   : > { %v1524_v7 = vsel %vm1520_vm1, %v1519_v5, -inf }
 0x384   : > { %1525 = vmax.xlane.f32.xlu0 %v1524_v7 }
 0x409   : > { %v1523_v16 = vpop.xlane.xlu0 %1522 }
 0x40a   : > { %v1527_v17 = vsub.f32 %v1518_v57, %v1523_v16  ;;  %v1640_v57 = vpack.c.bf16 %v1347_v53, %v1347_v53 }
 0x40c   : > { %v1529_v20 = vmul.f32 1.442695, %v1527_v17 }
 0x40e   : > { %3340 = vpow2.f32 %v1529_v20 }
 0x411   : > { %v1526_v21 = vpop.xlane.xlu0 %1525 }
 0x412   : > { %v1528_v23 = vsub.f32 %v1519_v5, %v1526_v21 }
 0x414   : > { %v1531_v24 = vmul.f32 1.442695, %v1528_v23 }
 0x416   : > { %3342 = vpow2.f32 %v1531_v24 }
 0x418   : > { %v3341_v25 = vpop.eup %3340 }
 0x419   : > { %v1533_v26 = vsel %vm1520_vm1, %v3341_v25, 0.0 }
 0x41a   : > { %1534 = vadd.xlane.f32.xlu1 %v1533_v26 }
 0x420   : > { %v3343_v27 = vpop.eup %3342 }
 0x421   : > { %v1536_v28 = vsel %vm1520_vm1, %v3343_v27, 0.0 }
 0x422   : > { %1537 = vadd.xlane.f32.xlu1 %v1536_v28 }
 0x4a7   : > { %v1535_v43 = vpop.xlane.xlu1 %1534 }
 0x4a8   : > { %3344 = vrcp.f32 %v1535_v43  ;;  %v3315_v43 = vld [vmem:[%s4003_s3 + $0x18] sm:$0xff]  }
 0x4af   : > { %v1538_v44 = vpop.xlane.xlu1 %1537 }
 0x4b0   : > { %3346 = vrcp.f32 %v1538_v44  ;;  %v3316_v44 = vld [vmem:[%s4003_s3 + $0x60] sm:$0xff]  }
 0x4b2   : > { %v3345_v45 = vpop.eup %3344 }
 0x4b3   : > { %v1541_v47 = vmul.f32 %v3345_v45, %v3341_v25  ;;  %v3317_v45 = vld [vmem:[%s4003_s3 + $0x20] sm:$0xff]  }
 0x4b5   : > { %v1543_v48 = vpack.c.bf16 %v1541_v47, %v1541_v47 }
 0x4b7   : > { %3025 = vmatmul.mubr.msk.bf16.vlgmr.msra.gmra.mrb[12].mxu1 %vm1520_vm1, %v1543_v48 }
 0x4b8   : > { %3029 = vmatpush3.bf16.msra.mxu1 %v1596_v41  ;;  %3030 = vmatprep.mubr.msk.bf16.mxu1 %vm3620_vm0, %v3619_v4  ;;  %v3314_v41 = vld [vmem:[%s4003_s3 + $0x58] sm:$0xff]  }
 0x4b9   : > { %3034 = vmatprep.subr.bf16.mxu1 %v3619_v4 }
 0x4ba   : > { %v3347_v50 = vpop.eup %3346 }
 0x4bb   : > { %v1542_v54 = vmul.f32 %v3347_v50, %v3343_v27 }
 0x4bd   : > { %v1544_v55 = vpack.c.bf16 %v1542_v54, %v1542_v54 }
 0x4bf   : > { %3031 = vmatmul.mubr.msk.bf16.vlgmr.msra.gmra.mrb[16].mxu1 %vm1520_vm1, %v1544_v55  ;;  %v3318_v55 = vld [vmem:[%s4003_s3 + $0x68] sm:$0xff]  }
 0x4c0   : > { %3036 = vmatprep.mubr.msk.bf16.mxu1 %vm3620_vm0, %v3619_v4 }
 0x4c1   : > { %3035 = vmatpush3.bf16.xpose.msra.mxu1 %v1640_v57  ;;  %v3321_v57 = vld [vmem:[%s4003_s3 + $0x30] sm:$0xff]  }
 0x4c2   : > { %3040 = vmatprep.subr.bf16.mxu1 %v3619_v4 }
 0x4c8   : > { %3037 = vmatmul.mubr.bf16.vlgmr.msra.gmra.mrb[20].mxu1 %v1638_v6 }
 0x4c9   : > { %3041 = vmatpush3.bf16.xpose.msra.mxu1 %v1641_v61  ;;  %3042 = vmatprep.mubr.msk.bf16.mxu1 %vm3620_vm0, %v3619_v4 }
 0x4ca   : > { %3046 = vmatprep.subr.bf16.mxu1 %v3619_v4 }
 0x4d0   : > { %3043 = vmatmul.mubr.bf16.vlgmr.msra.gmra.mrb[24].mxu1 %v1639_v14 }
 0x4d1   : > { %3047 = vmatpush3.bf16.msra.mxu1 %v1756_v40  ;;  %3048 = vmatprep.mubr.msk.bf16.mxu1 %vm3620_vm0, %v3619_v4  ;;  %v3313_v40 = vld [vmem:[%s4003_s3 + $0x10] sm:$0xff]  }
 0x4d2   : > { %3052 = vmatprep.subr.bf16.mxu1 %v3619_v4  ;;  %2957 = vmatpush3.bf16.msra.mxu0 %v3313_v40 }
 0x4d3   : > { %2958 = vmatprep.subr.bf16.mxu0 %v3314_v41 }
 0x4d6   : > { %2959 = vmatpush3.bf16.msra.mxu0 %v3315_v43 }
 0x4d7   : > { %2960 = vmatprep.subr.bf16.mxu0 %v3316_v44 }
 0x4da   : > { %2961 = vmatpush3.bf16.msra.mxu0 %v3317_v45  ;;  %v2890_v45 = vld [vmem:[%s4426_s23] ss:$0 sm:$0xff] }
 0x4db   : > { %2962 = vmatprep.subr.bf16.mxu0 %v3318_v55 }
 0x4de   : > { %2963 = vmatpush3.bf16.msra.mxu0 %v3319_v56 }
 0x58a   : > { %v4194_v18 = vpop.f32.mrb[12].mxu1 }
 0x58b   : > { %v3026_v19 = vpop.f32.mrb[13].mxu1 }
 0x58c   : > { %v1589_v62 = vpop.f32.mrb[14].mxu1 }
 0x58d   : > { %v3027_v63 = vpop.f32.mrb[15].mxu1 }
 0x592   : > { %v4196_v2 = vpop.f32.mrb[16].mxu1 }
 0x593   : > { %v1844_v22 = vpack.c.bf16 %v4196_v2, %v4194_v18  ;;  %v3032_v3 = vpop.f32.mrb[17].mxu1 }
 0x594   : > { %v1635_v5 = vpop.f32.mrb[18].mxu1 }
 0x595   : > { %v3033_v7 = vpop.f32.mrb[19].mxu1 }
 0x59b   : > { %v1678_v10 = vpop.f32.mrb[20].mxu1 }
 0x59c   : > { %v1724_v11 = vmul.f32 0.25, %v1678_v10  ;;  %v3038_v12 = vpop.f32.mrb[21].mxu1  ;;  %v2873_v10 = vld [vmem:[%s4424_s1] ss:$0 sm:$0xff] }
 0x59d   : > { %v1681_v13 = vpop.f32.mrb[22].mxu1 }
 0x59e   : > { %v3039_v15 = vpop.f32.mrb[23].mxu1  ;;  %v1726_v9 = vadd.f32 %v1724_v11, %v4150_v51 }
 0x5a0   : > { %v1728_v16 = vsel %vm1520_vm1, %v1726_v9, -inf }
 0x5a1   : > { %1729 = vmax.xlane.f32.xlu0 %v1728_v16 }
 0x5a3   : > { %v1718_v17 = vpop.f32.mrb[24].mxu1 }
 0x5a4   : > { %v1725_v20 = vmul.f32 0.25, %v1718_v17  ;;  %v3044_v21 = vpop.f32.mrb[25].mxu1 }
 0x5a5   : > { %v1721_v23 = vpop.f32.mrb[26].mxu1  ;;  %v3324_v21 = vld [vmem:[%s4026_s6] sm:$0xff]  }
 0x5a6   : > { %v3045_v24 = vpop.f32.mrb[27].mxu1  ;;  %v1727_v25 = vadd.f32 %v1725_v20, %v4155_v60  ;;  %v3325_v23 = vld [vmem:[%s4026_s6 + $0x8] sm:$0xff]  }
 0x5a7   : > { %v3328_v24 = vld [vmem:[%s4026_s6 + $0x20] sm:$0xff]  }
 0x5a8   : > { %v1731_v26 = vsel %vm1520_vm1, %v1727_v25, -inf }
 0x5a9   : > { %1732 = vmax.xlane.f32.xlu1 %v1731_v26  ;;  %v3330_v26 = vld [vmem:[%s4026_s6 + $0x30] sm:$0xff]  }
 0x62e   : > { %v1730_v27 = vpop.xlane.xlu0 %1729 }
 0x62f   : > { %v1734_v28 = vsub.f32 %v1726_v9, %v1730_v27  ;;  %v3331_v27 = vld [vmem:[%s4026_s6 + $0x38] sm:$0xff]  }
 0x631   : > { %v1736_v29 = vmul.f32 1.442695, %v1734_v28 }
 0x633   : > { %3348 = vpow2.f32 %v1736_v29 }
 0x636   : > { %v1733_v51 = vpop.xlane.xlu1 %1732 }
 0x637   : > { %v1735_v30 = vsub.f32 %v1727_v25, %v1733_v51  ;;  %v3329_v25 = vld [vmem:[%s4026_s6 + $0x28] sm:$0xff]  }
 0x639   : > { %v1738_v31 = vmul.f32 1.442695, %v1735_v30 }
 0x63b   : > { %3350 = vpow2.f32 %v1738_v31 }
 0x63d   : > { %v3349_v32 = vpop.eup %3348 }
 0x63e   : > { %v1740_v60 = vsel %vm1520_vm1, %v3349_v32, 0.0 }
 0x63f   : > { %1741 = vadd.xlane.f32.xlu0 %v1740_v60 }
 0x645   : > { %v3351_v33 = vpop.eup %3350 }
 0x646   : > { %v1743_v34 = vsel %vm1520_vm1, %v3351_v33, 0.0 }
 0x647   : > { %1744 = vadd.xlane.f32.xlu1 %v1743_v34 }
 0x6cc   : > { %v1742_v46 = vpop.xlane.xlu0 %1741 }
 0x6cd   : > { %3352 = vrcp.f32 %v1742_v46 }
 0x6d4   : > { %v1745_v47 = vpop.xlane.xlu1 %1744 }
 0x6d5   : > { %3354 = vrcp.f32 %v1745_v47 }
 0x6d7   : > { %v3353_v48 = vpop.eup %3352 }
 0x6d8   : > { %v1748_v49 = vmul.f32 %v3353_v48, %v3349_v32 }
 0x6da   : > { %v1750_v50 = vpack.c.bf16 %v1748_v49, %v1748_v49 }
 0x6dc   : > { %3049 = vmatmul.mubr.msk.bf16.vlgmr.msra.gmra.mrb[28].mxu1 %vm1520_vm1, %v1750_v50 }
 0x6dd   : > { %3053 = vmatpush3.bf16.msra.mxu1 %v4170_v42  ;;  %3054 = vmatprep.mubr.msk.bf16.mxu1 %vm3620_vm0, %v3619_v4  ;;  %v3320_v42 = vld [vmem:[%s4003_s3 + $0x70] sm:$0xff]  }
 0x6de   : > { %3058 = vmatprep.subr.bf16.mxu1 %v3619_v4  ;;  %2964 = vmatprep.subr.bf16.mxu0 %v3320_v42  ;;  %v3332_v42 = vld [vmem:[%s3979_s21] sm:$0xff]  }
 0x6df   : > { %v3355_v52 = vpop.eup %3354  ;;  %2965 = vmatpush3.bf16.msra.mxu0 %v3321_v57  ;;  %v3333_v57 = vld [vmem:[%s3979_s21 + $0x8] sm:$0xff]  }
 0x6e0   : > { %v1749_v53 = vmul.f32 %v3355_v52, %v3351_v33  ;;  %2966 = vmatprep.subr.bf16.mxu0 %v3322_v58  ;;  %v2891_v52 = vld [vmem:[%s874_s0] ss:$0 sm:$0xff] }
 0x6e1   : > { %v3334_v58 = vld [vmem:[%s3979_s21 + $0x10] sm:$0xff]  }
 0x6e2   : > { %v1751_v54 = vpack.c.bf16 %v1749_v53, %v1749_v53 }
 0x6e3   : > { %2967 = vmatpush3.bf16.msra.mxu0 %v3323_v59  ;;  %v3335_v59 = vld [vmem:[%s3979_s21 + $0x18] sm:$0xff]  }
 0x6e4   : > { %3055 = vmatmul.mubr.msk.bf16.vlgmr.msra.gmra.mrb[32].mxu1 %vm1520_vm1, %v1751_v54  ;;  %3078 = vmatprep.subr.bf16.mxu0 %v3619_v4 }
 0x6e5   : > { %3074 = vmatprep.mubr.msk.bf16.mxu1 %vm3620_vm0, %v3619_v4  ;;  %3059 = vmatpush3.bf16.msra.mxu1 %v3324_v21 }
 0x6e6   : > { %3060 = vmatprep.subr.bf16.mxu1 %v3619_v4 }
 0x6e9   : > { %3061 = vmatpush3.bf16.msra.mxu1 %v3325_v23 }
 0x6ea   : > { %3062 = vmatprep.subr.bf16.mxu1 %v3619_v4 }
 0x7af   : > { %v1792_v6 = vpop.f32.mrb[28].mxu1 }
 0x7b0   : > { %v3050_v61 = vpop.f32.mrb[29].mxu1 }
 0x7b1   : > { %v1795_v8 = vpop.f32.mrb[30].mxu1  ;;  %v3337_v61 = vld [vmem:[%s3979_s21 + $0x28] sm:$0xff]  }
 0x7b2   : > { %v3051_v14 = vpop.f32.mrb[31].mxu1  ;;  %v3338_v8 = vld [vmem:[%s3979_s21 + $0x30] sm:$0xff]  }
 0x7b3   : > { %v3339_v14 = vld [vmem:[%s3979_s21 + $0x38] sm:$0xff]  }
 0x7b7   : > { %v1838_v19 = vpop.f32.mrb[32].mxu1 }
 0x7b8   : > { %v1845_v62 = vpack.c.bf16 %v1838_v19, %v1792_v6  ;;  %v3056_v63 = vpop.f32.mrb[33].mxu1  ;;  %v3336_v6 = vld [vmem:[%s3979_s21 + $0x20] sm:$0xff]   ;;  %v2892_v19 = vld [vmem:[%s882_s11] ss:$0 sm:$0xff] }
 0x7b9   : > { %v1841_v3 = vpop.f32.mrb[34].mxu1 }
 0x7ba   : > { %v3057_v5 = vpop.f32.mrb[35].mxu1  ;;  %2013 = vmatprep.mubr.bf16.mxu0 %v1845_v62 }
 0x7bb   : > { %2014 = vmatmul.mubr.bf16.vlgmr.msra.gmra.mrb[8].mxu0 %v1844_v22 }
 0x7bc   : > { %3094 = vmatprep.mubr.msk.bf16.mxu0 %vm3620_vm0, %v3619_v4  ;;  %3079 = vmatpush3.bf16.msra.mxu0 %v3332_v42 }
 0x7bd   : > { %3080 = vmatprep.subr.bf16.mxu0 %v3619_v4 }
 0x7c0   : > { %3081 = vmatpush3.bf16.msra.mxu0 %v3333_v57 }
 0x7c1   : > { %3082 = vmatprep.subr.bf16.mxu0 %v3619_v4 }
 0x7c4   : > { %3083 = vmatpush3.bf16.msra.mxu0 %v3334_v58 }
 0x7c5   : > { %3084 = vmatprep.subr.bf16.mxu0 %v3619_v4 }
 0x7c8   : > { %3085 = vmatpush3.bf16.msra.mxu0 %v3335_v59  ;;  %v2911_v59 = vld [vmem:[%s4431_s28] ss:$0 sm:$0xff] }
 0x7c9   : > { %3086 = vmatprep.subr.bf16.mxu0 %v3619_v4 }
 0x7cc   : > { %3087 = vmatpush3.bf16.msra.mxu0 %v3336_v6 }
 0x7cd   : > { %3088 = vmatprep.subr.bf16.mxu0 %v3619_v4 }
 0x7d0   : > { %3089 = vmatpush3.bf16.msra.mxu0 %v3337_v61 }
 0x7d1   : > { %3090 = vmatprep.subr.bf16.mxu0 %v3619_v4 }
 0x7d4   : > { %3091 = vmatpush3.bf16.msra.mxu0 %v3338_v8 }
 0x7d5   : > { %3092 = vmatprep.subr.bf16.mxu0 %v3619_v4 }
 0x7d8   : > { %3093 = vmatpush3.bf16.msra.mxu0 %v3339_v14 }
 0x88e   : > { %v2968_v7 = vpop.f32.mrb[8].mxu0 }
 0x88f   : > { %v2969_v11 = vpop.f32.mrb[9].mxu0 }
 0x890   : > { %v2970_v12 = vadd.f32 %v2969_v11, %v2968_v7  ;;  %v2971_v13 = vpop.f32.mrb[10].mxu0 }
 0x891   : > { %v2972_v15 = vpop.f32.mrb[11].mxu0 }
 0x892   : > { %v2016_v9 = vadd.f32 %v2970_v12, %v2873_v10  ;;  %v2973_v16 = vadd.f32 %v2972_v15, %v2971_v13 }
 0x894   : > { %v2019_v18 = vadd.f32 %v2973_v16, %v2873_v10  ;;  %v2022_v2 = vadd.f32 %v2016_v9, %v4087_v0  ;;  %v3326_v0 = vld [vmem:[%s4026_s6 + $0x10] sm:$0xff]  }
 0x895   : > { %3063 = vmatpush3.bf16.msra.mxu1 %v3326_v0 }
 0x896   : > { %2026 = vadd.xlane.f32.xlu0 %v2022_v2  ;;  %v2023_v22 = vadd.f32 %v2019_v18, %v4089_v1  ;;  %v2032_v17 = vmul.f32 %v2022_v2, %v2022_v2  ;;  %3064 = vmatprep.subr.bf16.mxu1 %v3619_v4  ;;  %v3327_v1 = vld [vmem:[%s4026_s6 + $0x18] sm:$0xff]  }
 0x898   : > { %2028 = vadd.xlane.f32.xlu1 %v2023_v22  ;;  %v2033_v20 = vmul.f32 %v2023_v22, %v2023_v22 }
 0x899   : > { %3065 = vmatpush3.bf16.msra.mxu1 %v3327_v1 }
 0x89a   : > { %2034 = vadd.xlane.f32.xlu0 %v2032_v17  ;;  %3066 = vmatprep.subr.bf16.mxu1 %v3619_v4 }
 0x89c   : > { %2036 = vadd.xlane.f32.xlu1 %v2033_v20 }
 0x89d   : > { %3067 = vmatpush3.bf16.msra.mxu1 %v3328_v24 }
 0x89e   : > { %3068 = vmatprep.subr.bf16.mxu1 %v3619_v4 }
 0x8a1   : > { %3069 = vmatpush3.bf16.msra.mxu1 %v3329_v25 }
 0x8a2   : > { %3070 = vmatprep.subr.bf16.mxu1 %v3619_v4 }
 0x8a5   : > { %3071 = vmatpush3.bf16.msra.mxu1 %v3330_v26 }
 0x8a6   : > { %3072 = vmatprep.subr.bf16.mxu1 %v3619_v4 }
 0x8a9   : > { %3073 = vmatpush3.bf16.msra.mxu1 %v3331_v27  ;;  %v2901_v27 = vld [vmem:[%s885_s15] ss:$0 sm:$0xff] }
 0x923   : > { %v2027_v28 = vpop.xlane.xlu0 %2026 }
 0x924   : > { %v2030_v29 = vmul.f32 0.03125, %v2027_v28 }
 0x925   : > { %v2029_v51 = vpop.xlane.xlu1 %2028 }
 0x926   : > { %v2031_v30 = vmul.f32 0.03125, %v2029_v51  ;;  %v2040_v32 = vmul.f32 %v2030_v29, %v2030_v29  ;;  %v2046_v43 = vsub.f32 %v2022_v2, %v2030_v29 }
 0x927   : > { %v2035_v31 = vpop.xlane.xlu0 %2034 }
 0x928   : > { %v2038_v60 = vmul.f32 0.03125, %v2035_v31  ;;  %v2041_v34 = vmul.f32 %v2031_v30, %v2031_v30  ;;  %v2047_v46 = vsub.f32 %v2023_v22, %v2031_v30 }
 0x929   : > { %v2037_v33 = vpop.xlane.xlu1 %2036 }
 0x92a   : > { %v2042_v35 = vsub.f32 %v2038_v60, %v2040_v32  ;;  %v2039_v36 = vmul.f32 0.03125, %v2037_v33 }
 0x92c   : > { %v2044_v37 = vmax.f32 %v2042_v35, 0.0  ;;  %v2043_v38 = vsub.f32 %v2039_v36, %v2041_v34 }
 0x92e   : > { %v2048_v39 = vadd.f32 1e-12, %v2044_v37  ;;  %v2045_v40 = vmax.f32 %v2043_v38, 0.0 }
 0x930   : > { %3356 = vrsqrt.f32 %v2048_v39  ;;  %v2049_v41 = vadd.f32 1e-12, %v2045_v40 }
 0x932   : > { %3358 = vrsqrt.f32 %v2049_v41 }
 0x93a   : > { %v3357_v44 = vpop.eup %3356 }
 0x93b   : > { %v2052_v47 = vmul.f32 %v3357_v44, %v2046_v43 }
 0x93c   : > { %v3359_v48 = vpop.eup %3358 }
 0x93d   : > { %v2053_v49 = vmul.f32 %v3359_v48, %v2047_v46  ;;  %v2060_v50 = vmul.f32 %v2890_v45, %v2052_v47 }
 0x93f   : > { %v2061_v53 = vmul.f32 %v2890_v45, %v2053_v49  ;;  %v2068_v54 = vadd.f32 %v2891_v52, %v2060_v50 }
 0x941   : > { %v4268_v55 = vadd.f32 %v2891_v52, %v2061_v53 }
 0x943   : > { %v2070_v56 = vpack.c.bf16 %v4268_v55, %v2068_v54 }
 0x945   : > { %3075 = vmatmul.mubr.bf16.vlgmr.msra.gmra.mrb[36].mxu1 %v2070_v56  ;;  %v2910_v56 = vld [vmem:[%s888_s17] ss:$0 sm:$0xff] }
 0xa18   : > { %v2176_v62 = vpop.f32.mrb[36].mxu1 }
 0xa19   : > { %v2177_v63 = vadd.f32 %v2892_v19, %v2176_v62  ;;  %v3076_v3 = vpop.f32.mrb[37].mxu1  ;;  %v3368_v62 = vld [vmem:[#allocation8] sm:$0xff] (!%p2912_p8)  }
 0xa1a   : > { %v2179_v5 = vpop.f32.mrb[38].mxu1  ;;  %v3369_v3 = vld [vmem:[#allocation8 + $0x8] sm:$0xff] (!%p2912_p8)  }
 0xa1b   : > { %v2185_v7 = vmul.f32 0.044715, %v2177_v63  ;;  %v2180_v10 = vadd.f32 %v2892_v19, %v2179_v5  ;;  %v3077_v11 = vpop.f32.mrb[39].mxu1  ;;  %v2183_v23 = vmul.f32 0.5, %v2177_v63  ;;  %v3370_v5 = vld [vmem:[#allocation8 + $0x10] sm:$0xff] (!%p2912_p8)  }
 0xa1c   : > { %v3377_v11 = vld [vmem:[#allocation11 + $0x8] sm:$0xff] (!%p2912_p8)  }
 0xa1d   : > { %v2187_v12 = vmul.f32 %v2185_v7, %v2177_v63  ;;  %v2186_v13 = vmul.f32 0.044715, %v2180_v10  ;;  %v2184_v0 = vmul.f32 0.5, %v2180_v10  ;;  %v3376_v7 = vld [vmem:[#allocation11] sm:$0xff] (!%p2912_p8)  }
 0xa1f   : > { %v2189_v15 = vmul.f32 %v2187_v12, %v2177_v63  ;;  %v2188_v9 = vmul.f32 %v2186_v13, %v2180_v10  ;;  %v3372_v12 = vld [vmem:[#allocation8 + $0x20] sm:$0xff] (!%p2912_p8)   ;;  %v3378_v13 = vld [vmem:[#allocation11 + $0x10] sm:$0xff] (!%p2912_p8)  }
 0xa21   : > { %v2191_v16 = vadd.f32 %v2189_v15, %v2177_v63  ;;  %v2190_v18 = vmul.f32 %v2188_v9, %v2180_v10  ;;  %v3622_v63 = vmov (!%p2912_p8), 0.0   ;;  %v3373_v15 = vld [vmem:[#allocation8 + $0x28] sm:$0xff] (!%p2912_p8)   ;;  %v3379_v9 = vld [vmem:[#allocation11 + $0x18] sm:$0xff] (!%p2912_p8)  }
 0xa22   : > { %3098 = vmatprep.subr.bf16.mxu0 (!%p2912_p8), %v3622_v63  ;;  %3118 = vmatprep.subr.bf16.mxu1 (!%p2912_p8), %v3622_v63 }
 0xa23   : > { %v2193_v4 = vmul.f32 0.7978846, %v2191_v16  ;;  %v2192_v2 = vadd.f32 %v2190_v18, %v2180_v10  ;;  %3134 = vmatprep.mubr.msk.bf16.mxu1 (!%p2912_p8), %vm3623_vm3, %v3622_v63  ;;  %v3371_v10 = vld [vmem:[#allocation8 + $0x18] sm:$0xff] (!%p2912_p8)   ;;  %3119 = vmatpush3.bf16.msra.mxu1 (!%p2912_p8), %v3376_v7  ;;  %v3374_v16 = vld [vmem:[#allocation8 + $0x30] sm:$0xff] (!%p2912_p8)  }
 0xa24   : > { %3120 = vmatprep.subr.bf16.mxu1 (!%p2912_p8), %v3622_v63 }
 0xa25   : > { %3360 = vtanh.f32 %v2193_v4  ;;  %v2194_v22 = vmul.f32 0.7978846, %v2192_v2  ;;  %v3375_v4 = vld [vmem:[#allocation8 + $0x38] sm:$0xff] (!%p2912_p8)  }
 0xa27   : > { %3362 = vtanh.f32 %v2194_v22  ;;  %3121 = vmatpush3.bf16.msra.mxu1 (!%p2912_p8), %v3377_v11 }
 0xa28   : > { %3122 = vmatprep.subr.bf16.mxu1 (!%p2912_p8), %v3622_v63 }
 0xa2b   : > { %3123 = vmatpush3.bf16.msra.mxu1 (!%p2912_p8), %v3378_v13 }
 0xa2c   : > { %3124 = vmatprep.subr.bf16.mxu1 (!%p2912_p8), %v3622_v63 }
 0xa2f   : > { %v3361_v17 = vpop.eup %3360  ;;  %3125 = vmatpush3.bf16.msra.mxu1 (!%p2912_p8), %v3379_v9 }
 0xa30   : > { %v2197_v20 = vadd.f32 1.0, %v3361_v17  ;;  %3126 = vmatprep.subr.bf16.mxu1 (!%p2912_p8), %v3622_v63  ;;  %v3380_v17 = vld [vmem:[#allocation11 + $0x20] sm:$0xff] (!%p2912_p8)  }
 0xa31   : > { %v3363_v21 = vpop.eup %3362 }
 0xa32   : > { %v2198_v1 = vadd.f32 1.0, %v3363_v21  ;;  %v2199_v24 = vmul.f32 %v2197_v20, %v2183_v23  ;;  %v3381_v20 = vld [vmem:[#allocation11 + $0x28] sm:$0xff] (!%p2912_p8)   ;;  %v3382_v21 = vld [vmem:[#allocation11 + $0x30] sm:$0xff] (!%p2912_p8)   ;;  %v3383_v23 = vld [vmem:[#allocation11 + $0x38] sm:$0xff] (!%p2912_p8)  }
 0xa33   : > { %3127 = vmatpush3.bf16.msra.mxu1 (!%p2912_p8), %v3380_v17 }
 0xa34   : > { %v2200_v25 = vmul.f32 %v2198_v1, %v2184_v0  ;;  %3128 = vmatprep.subr.bf16.mxu1 (!%p2912_p8), %v3622_v63  ;;  %v2913_v0 = vld [vmem:[#allocation10] ss:$0 sm:$0xff] (!%p2912_p8) }
 0xa36   : > { %v2201_v26 = vpack.c.bf16 %v2200_v25, %v2199_v24 }
 0xa37   : > { %3129 = vmatpush3.bf16.msra.mxu1 (!%p2912_p8), %v3381_v20 }
 0xa38   : > { %3095 = vmatmul.mubr.bf16.vlgmr.msra.gmra.mrb[12].mxu0 %v2201_v26  ;;  %3130 = vmatprep.subr.bf16.mxu1 (!%p2912_p8), %v3622_v63 }
 0xa39   : > { %3099 = vmatpush3.bf16.msra.mxu0 (!%p2912_p8), %v3368_v62  ;;  %3114 = vmatprep.mubr.msk.bf16.mxu0 (!%p2912_p8), %vm3623_vm3, %v3622_v63 }
 0xa3a   : > { %3100 = vmatprep.subr.bf16.mxu0 (!%p2912_p8), %v3622_v63 }
 0xa3b   : > { %3131 = vmatpush3.bf16.msra.mxu1 (!%p2912_p8), %v3382_v21 }
 0xa3c   : > { %3132 = vmatprep.subr.bf16.mxu1 (!%p2912_p8), %v3622_v63 }
 0xa3d   : > { %3101 = vmatpush3.bf16.msra.mxu0 (!%p2912_p8), %v3369_v3 }
 0xa3e   : > { %3102 = vmatprep.subr.bf16.mxu0 (!%p2912_p8), %v3622_v63 }
 0xa3f   : > { %3133 = vmatpush3.bf16.msra.mxu1 (!%p2912_p8), %v3383_v23 }
 0xa41   : > { %3103 = vmatpush3.bf16.msra.mxu0 (!%p2912_p8), %v3370_v5 }
 0xa42   : > { %3104 = vmatprep.subr.bf16.mxu0 (!%p2912_p8), %v3622_v63 }
 0xa45   : > { %3105 = vmatpush3.bf16.msra.mxu0 (!%p2912_p8), %v3371_v10 }
 0xa46   : > { %3106 = vmatprep.subr.bf16.mxu0 (!%p2912_p8), %v3622_v63 }
 0xa49   : > { %3107 = vmatpush3.bf16.msra.mxu0 (!%p2912_p8), %v3372_v12 }
 0xa4a   : > { %3108 = vmatprep.subr.bf16.mxu0 (!%p2912_p8), %v3622_v63 }
 0xa4d   : > { %3109 = vmatpush3.bf16.msra.mxu0 (!%p2912_p8), %v3373_v15 }
 0xa4e   : > { %3110 = vmatprep.subr.bf16.mxu0 (!%p2912_p8), %v3622_v63 }
 0xa51   : > { %3111 = vmatpush3.bf16.msra.mxu0 (!%p2912_p8), %v3374_v16 }
 0xa52   : > { %3112 = vmatprep.subr.bf16.mxu0 (!%p2912_p8), %v3622_v63 }
 0xa55   : > { %3113 = vmatpush3.bf16.msra.mxu0 (!%p2912_p8), %v3375_v4 }
 0xb0b   : > { %v2307_v28 = vpop.f32.mrb[12].mxu0 }
 0xb0c   : > { %v2308_v29 = vadd.f32 %v2901_v27, %v2307_v28  ;;  %v3096_v51 = vpop.f32.mrb[13].mxu0 }
 0xb0d   : > { %v2310_v30 = vpop.f32.mrb[14].mxu0  ;;  %v2922_v51 = vld [vmem:[%s4432_s8] ss:$0 sm:$0xff] (!%p2912_p8) }
 0xb0e   : > { %v2314_v31 = vadd.f32 %v2308_v29, %v2068_v54  ;;  %v2311_v32 = vadd.f32 %v2901_v27, %v2310_v30  ;;  %v3097_v60 = vpop.f32.mrb[15].mxu0 }
 0xb10   : > { %v2315_v33 = vadd.f32 %v2311_v32, %v4268_v55  ;;  %2318 = vadd.xlane.f32.xlu0 %v2314_v31  ;;  %v2324_v34 = vmul.f32 %v2314_v31, %v2314_v31 }
 0xb12   : > { %2320 = vadd.xlane.f32.xlu1 %v2315_v33  ;;  %v2325_v35 = vmul.f32 %v2315_v33, %v2315_v33 }
 0xb14   : > { %2326 = vadd.xlane.f32.xlu0 %v2324_v34 }
 0xb16   : > { %2328 = vadd.xlane.f32.xlu1 %v2325_v35 }
 0xb9d   : > { %v2319_v36 = vpop.xlane.xlu0 %2318 }
 0xb9e   : > { %v2322_v37 = vmul.f32 0.03125, %v2319_v36 }
 0xb9f   : > { %v2321_v38 = vpop.xlane.xlu1 %2320 }
 0xba0   : > { %v2323_v39 = vmul.f32 0.03125, %v2321_v38  ;;  %v2332_v41 = vmul.f32 %v2322_v37, %v2322_v37  ;;  %v2338_v54 = vsub.f32 %v2314_v31, %v2322_v37 }
 0xba1   : > { %v2327_v40 = vpop.xlane.xlu0 %2326 }
 0xba2   : > { %v2330_v43 = vmul.f32 0.03125, %v2327_v40  ;;  %v2333_v45 = vmul.f32 %v2323_v39, %v2323_v39  ;;  %v2339_v42 = vsub.f32 %v2315_v33, %v2323_v39 }
 0xba3   : > { %v2329_v44 = vpop.xlane.xlu1 %2328 }
 0xba4   : > { %v2334_v46 = vsub.f32 %v2330_v43, %v2332_v41  ;;  %v2331_v47 = vmul.f32 0.03125, %v2329_v44 }
 0xba6   : > { %v2336_v48 = vmax.f32 %v2334_v46, 0.0  ;;  %v2335_v49 = vsub.f32 %v2331_v47, %v2333_v45 }
 0xba8   : > { %v2340_v50 = vadd.f32 1e-12, %v2336_v48  ;;  %v2337_v52 = vmax.f32 %v2335_v49, 0.0 }
 0xbaa   : > { %3364 = vrsqrt.f32 %v2340_v50  ;;  %v2341_v53 = vadd.f32 1e-12, %v2337_v52 }
 0xbac   : > { %3366 = vrsqrt.f32 %v2341_v53 }
 0xbb4   : > { %v3365_v55 = vpop.eup %3364 }
 0xbb5   : > { %v2344_v57 = vmul.f32 %v3365_v55, %v2338_v54 }
 0xbb6   : > { %v3367_v58 = vpop.eup %3366 }
 0xbb7   : > { %v2352_v6 = vmul.f32 %v2910_v56, %v2344_v57  ;;  %v2345_v61 = vmul.f32 %v3367_v58, %v2339_v42  ;;  %2367 = sbr.rel (%p2912_p8) target bundleno = 3452 (0xd7c), region = 132 }
 0xbb9   : > { %v2360_v8 = vadd.f32 %v2911_v59, %v2352_v6  ;;  %v2353_v14 = vmul.f32 %v2910_v56, %v2345_v61 }
 0xbbb   : > { %2362 = vst [vmem:[#allocation2] sm:$0xff] %v2360_v8  ;;  %v2361_v19 = vadd.f32 %v2911_v59, %v2353_v14 }
 0xbbd   : > { %2363 = vst [vmem:[#allocation2 + $0x8] sm:$0xff] %v2361_v19  ;;  %v2369_v18 = vrot.slane (!%p2912_p8), %v2361_v19, 7 }
 0xbbf   : > { %v2372_v2 = vsel %vm2371_vm4, %v2360_v8, %v2369_v18 }
 0xbc0   : > { %v2373_v22 = vpack.c.bf16 %v2372_v2, %v2372_v2 }
 0xbc2   : > { %3115 = vmatmul.mubr.bf16.vlgmr.msra.gmra.mrb[0].mxu0 %v2373_v22 }
 0xc95   : > { %v2479_v1 = vpop.f32.mrb[0].mxu0 }
 0xc96   : > { %v2480_v24 = vadd.f32 %v2913_v0, %v2479_v1  ;;  %v3116_v25 = vpop.f32.mrb[1].mxu0 }
 0xc97   : > { %v2482_v26 = vpop.f32.mrb[2].mxu0 }
 0xc98   : > { %3384 = vtanh.f32 %v2480_v24  ;;  %v3117_v27 = vpop.f32.mrb[3].mxu0 }
 0xca2   : > { %v3385_v28 = vpop.eup %3384 }
 0xca3   : > { %v2486_v29 = vpack.c.bf16 %v3385_v28, %v3385_v28 }
 0xca5   : > { %3135 = vmatmul.mubr.bf16.vlgmr.msra.gmra.mrb[0].mxu1 %v2486_v29 }
 0xd78   : > { %v2592_v30 = vpop.f32.mrb[0].mxu1 }
 0xd79   : > { %v2593_v31 = vadd.f32 %v2922_v51, %v2592_v30  ;;  %v3136_v32 = vpop.f32.mrb[1].mxu1 }
 0xd7a   : > { %v2595_v60 = vpop.f32.mrb[2].mxu1 }
 0xd7b   : > { %2598 = vst [vmem:[%s4433_s4] sm:$0x3] %v2593_v31  ;;  %v3137_v33 = vpop.f32.mrb[3].mxu1 }
 0xd7c PF: > { %s4434_s24 = sld [smem:[#allocation18_spill]]  ;;  %s4435_s9 = sld [smem:[#allocation17_spill]] }
 0xd7d   : > { %s4436_s23 = sld [smem:[#allocation19_spill]]  ;;  %s4437_s1 = smov %s3598_s22 }
 0xd82   : > { %p35_p0 = scmp.ge.s32.totalorder %s4434_s24, 4   ;;  %s4438_s22 = smov %s4435_s9 }
 0xd84   :  { %37 = sbr.rel (!%p35_p0) target bundleno = 27 (0x1b), region = 207 }
 0xd8b   :  { %2610 = vsyncpa [#allocation4], 1 }
 0xd8c   :  { %2612 = vsyncpa [#allocation4 + $0x1], 1 }
 0xd8d   :  { %2613 = vsyncpa [#allocation6], 1 }
 0xd8e   :  { %2615 = vsyncpa [#allocation6 + $0x1], 1 }
 0xd8f   :  { %2616 = vsyncpa [#allocation9], 1 }
 0xd90   :  { %2617 = vsyncpa [#allocation12], 1 }

</bundles_post_ra>
